<compile_context>
chip_gen: v6e
topology: v6e:2x2x1
jax: 0.10.0
libtpu: 0.0.40
codegen_flags: <defaults>
</compile_context>

<pallas_src>
import math
import numpy as np
import jax
import jax.numpy as jnp
from jax.experimental import pallas as pl
from jax.experimental.pallas import tpu as pltpu


# ----------------------------- kernel helpers -----------------------------

def _mish(a):
    """Mish forward only (time-MLP branch: no gradient w.r.t. x flows here)."""
    return a * jnp.tanh(jax.nn.softplus(a))


def _mish_fused(a):
    """Fused Mish forward + derivative.

    Shares softplus/tanh between forward and backward and derives
    sigmoid(a) = 1 - exp(-softplus(a)), so fwd+bwd costs ~4 transcendentals
    per element instead of ~7 when forward and derivative are separate.
    """
    sp = jax.nn.softplus(a)
    th = jnp.tanh(sp)
    sig = 1.0 - jnp.exp(-sp)                 # == sigmoid(a)
    h = a * th
    d = th + a * (1.0 - th * th) * sig       # d(mish)/da
    return h, d


def _mm(w, h):
    # [M,K] @ [K,B] -> [M,B] on the MXU, fp32 accumulation; B (batch) on lanes.
    return jax.lax.dot_general(w, h, (((1,), (0,)), ((), ())),
                               preferred_element_type=jnp.float32)


# ------------------------------- the kernel -------------------------------

def ebm_grad_kernel(xo_ref, t_ref, freqs_ref,
                    wt1s_ref, wt1c_ref, bt1_ref, wt2_ref, bt2_ref,
                    w1xo_ref, w1t_ref, b1_ref,
                    w2_ref, b2_ref, w3_ref, b3_ref, w4_ref, b4_ref,
                    w1x_bwd_ref, w2_bwd_ref, w3_bwd_ref, w4_bwd_ref,
                    grad_ref):
    # Feature-major: every activation is [feature, TILE_B] (batch on lanes).
    xo = xo_ref[...]                                  # [A+O, TB]
    t = t_ref[...]                                    # [1, TB]
    A = grad_ref.shape[0]
    x = xo[:A, :]                                     # sublane slice (A mult of 8)

    # ---- sinusoidal time embedding, computed in-kernel (EUP sin/cos) ----
    arg = freqs_ref[...] * t                          # [half,1]*[1,TB] -> [half,TB]
    emb_sin = jnp.sin(arg)
    emb_cos = jnp.cos(arg)

    # ---- time MLP (no dependence on x -> plain Mish, no derivative) ----
    at1 = (_mm(wt1s_ref[...], emb_sin) + _mm(wt1c_ref[...], emb_cos)
           + bt1_ref[...])                            # [2T, TB]
    temb = _mm(wt2_ref[...], _mish(at1)) + bt2_ref[...]   # [T, TB]

    # ---- main MLP forward (first layer split over concat [xo, temb]);
    #      Mish derivative captured alongside the activation ----
    a1 = _mm(w1xo_ref[...], xo) + _mm(w1t_ref[...], temb) + b1_ref[...]
    h1, d1 = _mish_fused(a1)
    a2 = _mm(w2_ref[...], h1) + b2_ref[...]
    h2, d2 = _mish_fused(a2)
    a3 = _mm(w3_ref[...], h2) + b3_ref[...]
    h3, d3 = _mish_fused(a3)
    score = _mm(w4_ref[...], h3) + b4_ref[...]        # [A, TB]

    # ---- energy residual + analytic VJP (backward weights pre-transposed:
    #      every backward matmul is a plain [M,K]@[K,TB], no relayout) ----
    g = 2.0 * (score - x)                  # dL/d(score)      [A, TB]
    g3 = _mm(w4_bwd_ref[...], g) * d3      # dL/da3           [H, TB]
    g2 = _mm(w3_bwd_ref[...], g3) * d2     # dL/da2
    g1 = _mm(w2_bwd_ref[...], g2) * d1     # dL/da1
    gx = _mm(w1x_bwd_ref[...], g1)         # x-slice of concat [A, TB]

    grad_ref[...] = (gx - g).astype(grad_ref.dtype)   # lane-dense store


# ----------------------- one-time parameter preparation ---------------------

def prepare_params(p):
    """Split/transpose/reshape the PyTorch parameters ONCE (not per call).

    Feature-major layout: forward weights keep the native PyTorch [out, in]
    layout; backward (VJP) weights are transposed once to [in, out]; biases
    become [out, 1] columns; the sinusoidal frequency table is precomputed.
    """
    T = int(p["time_dim"])
    half = T // 2
    assert half >= 2, "time_dim must be >= 4 (SinusoidalPosEmb divides by half-1)"
    A = p["w4"].shape[0]                      # final layer weight: [A, H]

    scale = math.log(10000.0) / (half - 1)
    freqs = jnp.exp(-scale * jnp.arange(half, dtype=jnp.float32)).reshape(half, 1)

    def f32(a):
        return jnp.asarray(a, jnp.float32)

    def bcol(b):
        return f32(b).reshape(-1, 1)

    w1 = f32(p["w1"])                         # [H, A+T+O]
    w1x, w1t, w1o = w1[:, :A], w1[:, A:A + T], w1[:, A + T:]
    wt1 = f32(p["wt1"])                       # [2T, T]

    return {
        "A": A, "T": T,
        "freqs": freqs,
        # forward weights: native [out, in]
        "wt1s": wt1[:, :half], "wt1c": wt1[:, half:], "bt1": bcol(p["bt1"]),
        "wt2": f32(p["wt2"]), "bt2": bcol(p["bt2"]),
        "w1xo": jnp.concatenate([w1x, w1o], axis=1),      # [H, A+O]
        "w1t": w1t, "b1": bcol(p["b1"]),
        "w2": f32(p["w2"]), "b2": bcol(p["b2"]),
        "w3": f32(p["w3"]), "b3": bcol(p["b3"]),
        "w4": f32(p["w4"]), "b4": bcol(p["b4"]),
        # backward (VJP) weights: transposed once, here
        "w1x_bwd": w1x.T,                                  # [A, H]
        "w2_bwd": f32(p["w2"]).T, "w3_bwd": f32(p["w3"]).T,
        "w4_bwd": f32(p["w4"]).T,                          # [H, A]
    }


# ------------------------------- wrapper -----------------------------------

def ebm_diffusion_forward(x, t, obs, prep, *, tile_b=256):
    """d/dx [ sum_b ((net(x,t,obs) - x)**2).sum(-1) ] — the module's forward.

    tile_b must be a multiple of 128 (batch sits on the lane axis).  On v7x
    choose tile_b so that ceil(B/tile_b) is >= 2 and even, so the "parallel"
    batch axis actually feeds both TensorCores.
    """
    B, A = x.shape
    assert tile_b % 128 == 0, "tile_b must be a multiple of 128 (lane axis)"

    # Pad batch to a multiple of the tile (static decision; no-op when aligned).
    Bp = ((B + tile_b - 1) // tile_b) * tile_b

    # Feature-major plumbing: one [A+O, Bp] slab, batch on lanes.
    xo = jnp.concatenate([x, obs], axis=-1).astype(jnp.float32).T   # [A+O, B]
    t1d = t.astype(jnp.float32)
    if Bp != B:
        pad = Bp - B
        xo = jnp.pad(xo, ((0, 0), (0, pad)))
        t1d = jnp.pad(t1d, (0, pad))
    t2d = t1d.reshape(1, Bp)

    grid = (Bp // tile_b,)

    def batch_spec(feat):
        return pl.BlockSpec((feat, tile_b), lambda i: (0, i))

    def resident_spec(a):
        # Full-array block, constant index_map -> DMA'd once, VMEM-resident.
        return pl.BlockSpec(a.shape, lambda i: (0, 0))

    weight_args = (prep["freqs"],
                   prep["wt1s"], prep["wt1c"], prep["bt1"],
                   prep["wt2"], prep["bt2"],
                   prep["w1xo"], prep["w1t"], prep["b1"],
                   prep["w2"], prep["b2"], prep["w3"], prep["b3"],
                   prep["w4"], prep["b4"],
                   prep["w1x_bwd"], prep["w2_bwd"], prep["w3_bwd"],
                   prep["w4_bwd"])

    in_specs = ([batch_spec(xo.shape[0]), batch_spec(1)]
                + [resident_spec(a) for a in weight_args])

    out = pl.pallas_call(
        ebm_grad_kernel,
        out_shape=jax.ShapeDtypeStruct((A, Bp), jnp.float32),
        grid=grid,
        in_specs=in_specs,
        out_specs=pl.BlockSpec((A, tile_b), lambda i: (0, i)),
        compiler_params=pltpu.CompilerParams(
            dimension_semantics=("parallel",)),
    )(xo, t2d, *weight_args)

    out = out.T                                   # back to [Bp, A] for the caller
    return out[:B] if Bp != B else out


# ------------------------- pure-JAX reference ------------------------------

def sinusoidal_pos_emb(t, dim):
    half = dim // 2
    scale = math.log(10000.0) / (half - 1)
    freqs = jnp.exp(-scale * jnp.arange(half, dtype=jnp.float32))
    arg = t[:, None] * freqs[None, :]
    return jnp.concatenate([jnp.sin(arg), jnp.cos(arg)], axis=-1)


def _net_ref(x, t, obs, p):
    pos = sinusoidal_pos_emb(t.astype(jnp.float32), p["time_dim"])
    h = _mish(pos @ p["wt1"].T + p["bt1"])
    temb = h @ p["wt2"].T + p["bt2"]
    h0 = jnp.concatenate([x, temb, obs], axis=-1)
    h1 = _mish(h0 @ p["w1"].T + p["b1"])
    h2 = _mish(h1 @ p["w2"].T + p["b2"])
    h3 = _mish(h2 @ p["w3"].T + p["b3"])
    return h3 @ p["w4"].T + p["b4"]


def _ebm_forward_ref(x, t, obs, p):
    def loss(xx):
        s = _net_ref(xx, t, obs, p)
        return (((s - xx) ** 2).sum(-1)).sum()
    return jax.grad(loss)(x)


# ------------------------------- main --------------------------------------

if __name__ == "__main__":
    # batch, action_dim, obs_dim, time_dim, hidden_dim (small demo sizes).
    # B=500 exercises padding; TILE_B=256 -> Bp=512, grid=(2,) (even, feeds
    # both v7x TensorCores via the "parallel" batch axis).
    B, A, O, T, H = 500, 8, 16, 16, 32
    TILE_B = 256

    key = jax.random.PRNGKey(0)
    ks = jax.random.split(key, 16)

    def w(k, out_d, in_d):
        return (jax.random.normal(k, (out_d, in_d), jnp.float32)
                * (1.0 / math.sqrt(in_d)))

    params = {
        "time_dim": T,
        "wt1": w(ks[0], 2 * T, T),      "bt1": 0.01 * jax.random.normal(ks[1], (2 * T,), jnp.float32),
        "wt2": w(ks[2], T, 2 * T),      "bt2": 0.01 * jax.random.normal(ks[3], (T,), jnp.float32),
        "w1":  w(ks[4], H, A + T + O),  "b1":  0.01 * jax.random.normal(ks[5], (H,), jnp.float32),
        "w2":  w(ks[6], H, H),          "b2":  0.01 * jax.random.normal(ks[7], (H,), jnp.float32),
        "w3":  w(ks[8], H, H),          "b3":  0.01 * jax.random.normal(ks[9], (H,), jnp.float32),
        "w4":  w(ks[10], A, H),         "b4":  0.01 * jax.random.normal(ks[11], (A,), jnp.float32),
    }

    x = jax.random.normal(ks[12], (B, A), jnp.float32)
    obs = jax.random.normal(ks[13], (B, O), jnp.float32)
    t = jax.random.uniform(ks[14], (B,), jnp.float32, 0.0, 100.0)

    prep = prepare_params(params)               # one-time weight prep
    out = ebm_diffusion_forward(x, t, obs, prep, tile_b=TILE_B)
    out = jax.block_until_ready(out)

    ref = jax.block_until_ready(_ebm_forward_ref(x, t, obs, params))
    np.testing.assert_allclose(np.asarray(out), np.asarray(ref), rtol=1e-4, atol=1e-4)

    print("KERNEL_OK")
</pallas_src>

<mosaic_0001>
module attributes {stable_mosaic.version = 11 : i64} {
  func.func @ebm_grad_kernel(%arg0: i32, %arg1: memref<24x256xf32, #tpu.memory_space<vmem>>, %arg2: memref<1x256xf32, #tpu.memory_space<vmem>>, %arg3: memref<8x1xf32, #tpu.memory_space<vmem>>, %arg4: memref<32x8xf32, #tpu.memory_space<vmem>>, %arg5: memref<32x8xf32, #tpu.memory_space<vmem>>, %arg6: memref<32x1xf32, #tpu.memory_space<vmem>>, %arg7: memref<16x32xf32, #tpu.memory_space<vmem>>, %arg8: memref<16x1xf32, #tpu.memory_space<vmem>>, %arg9: memref<32x24xf32, #tpu.memory_space<vmem>>, %arg10: memref<32x16xf32, #tpu.memory_space<vmem>>, %arg11: memref<32x1xf32, #tpu.memory_space<vmem>>, %arg12: memref<32x32xf32, #tpu.memory_space<vmem>>, %arg13: memref<32x1xf32, #tpu.memory_space<vmem>>, %arg14: memref<32x32xf32, #tpu.memory_space<vmem>>, %arg15: memref<32x1xf32, #tpu.memory_space<vmem>>, %arg16: memref<8x32xf32, #tpu.memory_space<vmem>>, %arg17: memref<8x1xf32, #tpu.memory_space<vmem>>, %arg18: memref<8x32xf32, #tpu.memory_space<vmem>>, %arg19: memref<32x32xf32, #tpu.memory_space<vmem>>, %arg20: memref<32x32xf32, #tpu.memory_space<vmem>>, %arg21: memref<32x8xf32, #tpu.memory_space<vmem>>, %arg22: memref<8x256xf32, #tpu.memory_space<vmem>>) attributes {dimension_semantics = [#tpu.dimension_semantics<parallel>], iteration_bounds = array<i64: 2>, scalar_prefetch = 0 : i64, scratch_operands = 0 : i64, tpu.core_type = #tpu.core_type<tc>, window_params = [{transform_indices = @transform_0, window_bounds = array<i64: 24, 256>}, {transform_indices = @transform_1, window_bounds = array<i64: 1, 256>}, {pipeline_mode = #tpu.pipeline_mode<synchronous>, transform_indices = @transform_2, window_bounds = array<i64: 8, 1>}, {pipeline_mode = #tpu.pipeline_mode<synchronous>, transform_indices = @transform_3, window_bounds = array<i64: 32, 8>}, {pipeline_mode = #tpu.pipeline_mode<synchronous>, transform_indices = @transform_4, window_bounds = array<i64: 32, 8>}, {pipeline_mode = #tpu.pipeline_mode<synchronous>, transform_indices = @transform_5, window_bounds = array<i64: 32, 1>}, {pipeline_mode = #tpu.pipeline_mode<synchronous>, transform_indices = @transform_6, window_bounds = array<i64: 16, 32>}, {pipeline_mode = #tpu.pipeline_mode<synchronous>, transform_indices = @transform_7, window_bounds = array<i64: 16, 1>}, {pipeline_mode = #tpu.pipeline_mode<synchronous>, transform_indices = @transform_8, window_bounds = array<i64: 32, 24>}, {pipeline_mode = #tpu.pipeline_mode<synchronous>, transform_indices = @transform_9, window_bounds = array<i64: 32, 16>}, {pipeline_mode = #tpu.pipeline_mode<synchronous>, transform_indices = @transform_10, window_bounds = array<i64: 32, 1>}, {pipeline_mode = #tpu.pipeline_mode<synchronous>, transform_indices = @transform_11, window_bounds = array<i64: 32, 32>}, {pipeline_mode = #tpu.pipeline_mode<synchronous>, transform_indices = @transform_12, window_bounds = array<i64: 32, 1>}, {pipeline_mode = #tpu.pipeline_mode<synchronous>, transform_indices = @transform_13, window_bounds = array<i64: 32, 32>}, {pipeline_mode = #tpu.pipeline_mode<synchronous>, transform_indices = @transform_14, window_bounds = array<i64: 32, 1>}, {pipeline_mode = #tpu.pipeline_mode<synchronous>, transform_indices = @transform_15, window_bounds = array<i64: 8, 32>}, {pipeline_mode = #tpu.pipeline_mode<synchronous>, transform_indices = @transform_16, window_bounds = array<i64: 8, 1>}, {pipeline_mode = #tpu.pipeline_mode<synchronous>, transform_indices = @transform_17, window_bounds = array<i64: 8, 32>}, {pipeline_mode = #tpu.pipeline_mode<synchronous>, transform_indices = @transform_18, window_bounds = array<i64: 32, 32>}, {pipeline_mode = #tpu.pipeline_mode<synchronous>, transform_indices = @transform_19, window_bounds = array<i64: 32, 32>}, {pipeline_mode = #tpu.pipeline_mode<synchronous>, transform_indices = @transform_20, window_bounds = array<i64: 32, 8>}, {transform_indices = @transform_21, window_bounds = array<i64: 8, 256>}]} {
    %c0 = arith.constant 0 : index
    %c0_0 = arith.constant 0 : index
    %0 = vector.load %arg1[%c0, %c0_0] : memref<24x256xf32, #tpu.memory_space<vmem>>, vector<24x256xf32>
    %c0_1 = arith.constant 0 : index
    %c0_2 = arith.constant 0 : index
    %1 = vector.load %arg2[%c0_1, %c0_2] : memref<1x256xf32, #tpu.memory_space<vmem>>, vector<1x256xf32>
    %2 = vector.extract_strided_slice %0 {offsets = [0, 0], sizes = [8, 256], strides = [1, 1]} : vector<24x256xf32> to vector<8x256xf32>
    %c0_3 = arith.constant 0 : index
    %c0_4 = arith.constant 0 : index
    %3 = vector.load %arg3[%c0_3, %c0_4] : memref<8x1xf32, #tpu.memory_space<vmem>>, vector<8x1xf32>
    %4 = vector.broadcast %3 : vector<8x1xf32> to vector<8x256xf32>
    %5 = vector.broadcast %1 : vector<1x256xf32> to vector<8x256xf32>
    %6 = arith.mulf %4, %5 : vector<8x256xf32>
    %7 = math.sin %6 : vector<8x256xf32>
    %8 = math.cos %6 : vector<8x256xf32>
    %c0_5 = arith.constant 0 : index
    %c0_6 = arith.constant 0 : index
    %9 = vector.load %arg4[%c0_5, %c0_6] : memref<32x8xf32, #tpu.memory_space<vmem>>, vector<32x8xf32>
    %cst = arith.constant dense<0.000000e+00> : vector<32x256xf32>
    %10 = tpu.matmul %9, %7, %cst {dimension_numbers = #tpu.dot_dimension_numbers<[1], [0], [0], [1], [0, 0, 1, 1], [], []>} : vector<32x8xf32>, vector<8x256xf32>, vector<32x256xf32> -> vector<32x256xf32>
    %c0_7 = arith.constant 0 : index
    %c0_8 = arith.constant 0 : index
    %11 = vector.load %arg5[%c0_7, %c0_8] : memref<32x8xf32, #tpu.memory_space<vmem>>, vector<32x8xf32>
    %cst_9 = arith.constant dense<0.000000e+00> : vector<32x256xf32>
    %12 = tpu.matmul %11, %8, %cst_9 {dimension_numbers = #tpu.dot_dimension_numbers<[1], [0], [0], [1], [0, 0, 1, 1], [], []>} : vector<32x8xf32>, vector<8x256xf32>, vector<32x256xf32> -> vector<32x256xf32>
    %13 = arith.addf %10, %12 : vector<32x256xf32>
    %c0_10 = arith.constant 0 : index
    %c0_11 = arith.constant 0 : index
    %14 = vector.load %arg6[%c0_10, %c0_11] : memref<32x1xf32, #tpu.memory_space<vmem>>, vector<32x1xf32>
    %15 = vector.broadcast %14 : vector<32x1xf32> to vector<32x256xf32>
    %16 = arith.addf %13, %15 : vector<32x256xf32>
    %c0_12 = arith.constant 0 : index
    %c0_13 = arith.constant 0 : index
    %17 = vector.load %arg7[%c0_12, %c0_13] : memref<16x32xf32, #tpu.memory_space<vmem>>, vector<16x32xf32>
    %cst_14 = arith.constant 0.000000e+00 : f32
    %18 = vector.broadcast %cst_14 : f32 to vector<32x256xf32>
    %19 = arith.maximumf %16, %18 : vector<32x256xf32>
    %20 = vector.broadcast %cst_14 : f32 to vector<32x256xf32>
    %21 = arith.subf %16, %20 : vector<32x256xf32>
    %22 = arith.cmpf one, %21, %21 : vector<32x256xf32>
    %23 = vector.broadcast %cst_14 : f32 to vector<32x256xf32>
    %24 = arith.addf %16, %23 : vector<32x256xf32>
    %25 = math.absf %21 : vector<32x256xf32>
    %cst_15 = arith.constant 0.000000e+00 : f32
    %26 = vector.broadcast %cst_15 : f32 to vector<32x256xf32>
    %27 = arith.subf %26, %25 : vector<32x256xf32>
    %28 = math.exp %27 : vector<32x256xf32>
    %29 = math.log1p %28 : vector<32x256xf32>
    %30 = arith.addf %19, %29 : vector<32x256xf32>
    %31 = arith.select %22, %24, %30 : vector<32x256xi1>, vector<32x256xf32>
    %32 = math.tanh %31 : vector<32x256xf32>
    %33 = arith.mulf %16, %32 : vector<32x256xf32>
    %cst_16 = arith.constant dense<0.000000e+00> : vector<16x256xf32>
    %34 = tpu.matmul %17, %33, %cst_16 {dimension_numbers = #tpu.dot_dimension_numbers<[1], [0], [0], [1], [0, 0, 1, 1], [], []>} : vector<16x32xf32>, vector<32x256xf32>, vector<16x256xf32> -> vector<16x256xf32>
    %c0_17 = arith.constant 0 : index
    %c0_18 = arith.constant 0 : index
    %35 = vector.load %arg8[%c0_17, %c0_18] : memref<16x1xf32, #tpu.memory_space<vmem>>, vector<16x1xf32>
    %36 = vector.broadcast %35 : vector<16x1xf32> to vector<16x256xf32>
    %37 = arith.addf %34, %36 : vector<16x256xf32>
    %c0_19 = arith.constant 0 : index
    %c0_20 = arith.constant 0 : index
    %38 = vector.load %arg9[%c0_19, %c0_20] : memref<32x24xf32, #tpu.memory_space<vmem>>, vector<32x24xf32>
    %cst_21 = arith.constant dense<0.000000e+00> : vector<32x256xf32>
    %39 = tpu.matmul %38, %0, %cst_21 {dimension_numbers = #tpu.dot_dimension_numbers<[1], [0], [0], [1], [0, 0, 1, 1], [], []>} : vector<32x24xf32>, vector<24x256xf32>, vector<32x256xf32> -> vector<32x256xf32>
    %c0_22 = arith.constant 0 : index
    %c0_23 = arith.constant 0 : index
    %40 = vector.load %arg10[%c0_22, %c0_23] : memref<32x16xf32, #tpu.memory_space<vmem>>, vector<32x16xf32>
    %cst_24 = arith.constant dense<0.000000e+00> : vector<32x256xf32>
    %41 = tpu.matmul %40, %37, %cst_24 {dimension_numbers = #tpu.dot_dimension_numbers<[1], [0], [0], [1], [0, 0, 1, 1], [], []>} : vector<32x16xf32>, vector<16x256xf32>, vector<32x256xf32> -> vector<32x256xf32>
    %42 = arith.addf %39, %41 : vector<32x256xf32>
    %c0_25 = arith.constant 0 : index
    %c0_26 = arith.constant 0 : index
    %43 = vector.load %arg11[%c0_25, %c0_26] : memref<32x1xf32, #tpu.memory_space<vmem>>, vector<32x1xf32>
    %44 = vector.broadcast %43 : vector<32x1xf32> to vector<32x256xf32>
    %45 = arith.addf %42, %44 : vector<32x256xf32>
    %cst_27 = arith.constant 0.000000e+00 : f32
    %46 = vector.broadcast %cst_27 : f32 to vector<32x256xf32>
    %47 = arith.maximumf %45, %46 : vector<32x256xf32>
    %48 = vector.broadcast %cst_27 : f32 to vector<32x256xf32>
    %49 = arith.subf %45, %48 : vector<32x256xf32>
    %50 = arith.cmpf one, %49, %49 : vector<32x256xf32>
    %51 = vector.broadcast %cst_27 : f32 to vector<32x256xf32>
    %52 = arith.addf %45, %51 : vector<32x256xf32>
    %53 = math.absf %49 : vector<32x256xf32>
    %cst_28 = arith.constant 0.000000e+00 : f32
    %54 = vector.broadcast %cst_28 : f32 to vector<32x256xf32>
    %55 = arith.subf %54, %53 : vector<32x256xf32>
    %56 = math.exp %55 : vector<32x256xf32>
    %57 = math.log1p %56 : vector<32x256xf32>
    %58 = arith.addf %47, %57 : vector<32x256xf32>
    %59 = arith.select %50, %52, %58 : vector<32x256xi1>, vector<32x256xf32>
    %60 = math.tanh %59 : vector<32x256xf32>
    %cst_29 = arith.constant 0.000000e+00 : f32
    %61 = vector.broadcast %cst_29 : f32 to vector<32x256xf32>
    %62 = arith.subf %61, %59 : vector<32x256xf32>
    %63 = math.exp %62 : vector<32x256xf32>
    %cst_30 = arith.constant 1.000000e+00 : f32
    %64 = vector.broadcast %cst_30 : f32 to vector<32x256xf32>
    %65 = arith.subf %64, %63 : vector<32x256xf32>
    %66 = arith.mulf %45, %60 : vector<32x256xf32>
    %67 = arith.mulf %60, %60 : vector<32x256xf32>
    %cst_31 = arith.constant 1.000000e+00 : f32
    %68 = vector.broadcast %cst_31 : f32 to vector<32x256xf32>
    %69 = arith.subf %68, %67 : vector<32x256xf32>
    %70 = arith.mulf %45, %69 : vector<32x256xf32>
    %71 = arith.mulf %70, %65 : vector<32x256xf32>
    %72 = arith.addf %60, %71 : vector<32x256xf32>
    %c0_32 = arith.constant 0 : index
    %c0_33 = arith.constant 0 : index
    %73 = vector.load %arg12[%c0_32, %c0_33] : memref<32x32xf32, #tpu.memory_space<vmem>>, vector<32x32xf32>
    %cst_34 = arith.constant dense<0.000000e+00> : vector<32x256xf32>
    %74 = tpu.matmul %73, %66, %cst_34 {dimension_numbers = #tpu.dot_dimension_numbers<[1], [0], [0], [1], [0, 0, 1, 1], [], []>} : vector<32x32xf32>, vector<32x256xf32>, vector<32x256xf32> -> vector<32x256xf32>
    %c0_35 = arith.constant 0 : index
    %c0_36 = arith.constant 0 : index
    %75 = vector.load %arg13[%c0_35, %c0_36] : memref<32x1xf32, #tpu.memory_space<vmem>>, vector<32x1xf32>
    %76 = vector.broadcast %75 : vector<32x1xf32> to vector<32x256xf32>
    %77 = arith.addf %74, %76 : vector<32x256xf32>
    %cst_37 = arith.constant 0.000000e+00 : f32
    %78 = vector.broadcast %cst_37 : f32 to vector<32x256xf32>
    %79 = arith.maximumf %77, %78 : vector<32x256xf32>
    %80 = vector.broadcast %cst_37 : f32 to vector<32x256xf32>
    %81 = arith.subf %77, %80 : vector<32x256xf32>
    %82 = arith.cmpf one, %81, %81 : vector<32x256xf32>
    %83 = vector.broadcast %cst_37 : f32 to vector<32x256xf32>
    %84 = arith.addf %77, %83 : vector<32x256xf32>
    %85 = math.absf %81 : vector<32x256xf32>
    %cst_38 = arith.constant 0.000000e+00 : f32
    %86 = vector.broadcast %cst_38 : f32 to vector<32x256xf32>
    %87 = arith.subf %86, %85 : vector<32x256xf32>
    %88 = math.exp %87 : vector<32x256xf32>
    %89 = math.log1p %88 : vector<32x256xf32>
    %90 = arith.addf %79, %89 : vector<32x256xf32>
    %91 = arith.select %82, %84, %90 : vector<32x256xi1>, vector<32x256xf32>
    %92 = math.tanh %91 : vector<32x256xf32>
    %cst_39 = arith.constant 0.000000e+00 : f32
    %93 = vector.broadcast %cst_39 : f32 to vector<32x256xf32>
    %94 = arith.subf %93, %91 : vector<32x256xf32>
    %95 = math.exp %94 : vector<32x256xf32>
    %cst_40 = arith.constant 1.000000e+00 : f32
    %96 = vector.broadcast %cst_40 : f32 to vector<32x256xf32>
    %97 = arith.subf %96, %95 : vector<32x256xf32>
    %98 = arith.mulf %77, %92 : vector<32x256xf32>
    %99 = arith.mulf %92, %92 : vector<32x256xf32>
    %cst_41 = arith.constant 1.000000e+00 : f32
    %100 = vector.broadcast %cst_41 : f32 to vector<32x256xf32>
    %101 = arith.subf %100, %99 : vector<32x256xf32>
    %102 = arith.mulf %77, %101 : vector<32x256xf32>
    %103 = arith.mulf %102, %97 : vector<32x256xf32>
    %104 = arith.addf %92, %103 : vector<32x256xf32>
    %c0_42 = arith.constant 0 : index
    %c0_43 = arith.constant 0 : index
    %105 = vector.load %arg14[%c0_42, %c0_43] : memref<32x32xf32, #tpu.memory_space<vmem>>, vector<32x32xf32>
    %cst_44 = arith.constant dense<0.000000e+00> : vector<32x256xf32>
    %106 = tpu.matmul %105, %98, %cst_44 {dimension_numbers = #tpu.dot_dimension_numbers<[1], [0], [0], [1], [0, 0, 1, 1], [], []>} : vector<32x32xf32>, vector<32x256xf32>, vector<32x256xf32> -> vector<32x256xf32>
    %c0_45 = arith.constant 0 : index
    %c0_46 = arith.constant 0 : index
    %107 = vector.load %arg15[%c0_45, %c0_46] : memref<32x1xf32, #tpu.memory_space<vmem>>, vector<32x1xf32>
    %108 = vector.broadcast %107 : vector<32x1xf32> to vector<32x256xf32>
    %109 = arith.addf %106, %108 : vector<32x256xf32>
    %cst_47 = arith.constant 0.000000e+00 : f32
    %110 = vector.broadcast %cst_47 : f32 to vector<32x256xf32>
    %111 = arith.maximumf %109, %110 : vector<32x256xf32>
    %112 = vector.broadcast %cst_47 : f32 to vector<32x256xf32>
    %113 = arith.subf %109, %112 : vector<32x256xf32>
    %114 = arith.cmpf one, %113, %113 : vector<32x256xf32>
    %115 = vector.broadcast %cst_47 : f32 to vector<32x256xf32>
    %116 = arith.addf %109, %115 : vector<32x256xf32>
    %117 = math.absf %113 : vector<32x256xf32>
    %cst_48 = arith.constant 0.000000e+00 : f32
    %118 = vector.broadcast %cst_48 : f32 to vector<32x256xf32>
    %119 = arith.subf %118, %117 : vector<32x256xf32>
    %120 = math.exp %119 : vector<32x256xf32>
    %121 = math.log1p %120 : vector<32x256xf32>
    %122 = arith.addf %111, %121 : vector<32x256xf32>
    %123 = arith.select %114, %116, %122 : vector<32x256xi1>, vector<32x256xf32>
    %124 = math.tanh %123 : vector<32x256xf32>
    %cst_49 = arith.constant 0.000000e+00 : f32
    %125 = vector.broadcast %cst_49 : f32 to vector<32x256xf32>
    %126 = arith.subf %125, %123 : vector<32x256xf32>
    %127 = math.exp %126 : vector<32x256xf32>
    %cst_50 = arith.constant 1.000000e+00 : f32
    %128 = vector.broadcast %cst_50 : f32 to vector<32x256xf32>
    %129 = arith.subf %128, %127 : vector<32x256xf32>
    %130 = arith.mulf %109, %124 : vector<32x256xf32>
    %131 = arith.mulf %124, %124 : vector<32x256xf32>
    %cst_51 = arith.constant 1.000000e+00 : f32
    %132 = vector.broadcast %cst_51 : f32 to vector<32x256xf32>
    %133 = arith.subf %132, %131 : vector<32x256xf32>
    %134 = arith.mulf %109, %133 : vector<32x256xf32>
    %135 = arith.mulf %134, %129 : vector<32x256xf32>
    %136 = arith.addf %124, %135 : vector<32x256xf32>
    %c0_52 = arith.constant 0 : index
    %c0_53 = arith.constant 0 : index
    %137 = vector.load %arg16[%c0_52, %c0_53] : memref<8x32xf32, #tpu.memory_space<vmem>>, vector<8x32xf32>
    %cst_54 = arith.constant dense<0.000000e+00> : vector<8x256xf32>
    %138 = tpu.matmul %137, %130, %cst_54 {dimension_numbers = #tpu.dot_dimension_numbers<[1], [0], [0], [1], [0, 0, 1, 1], [], []>} : vector<8x32xf32>, vector<32x256xf32>, vector<8x256xf32> -> vector<8x256xf32>
    %c0_55 = arith.constant 0 : index
    %c0_56 = arith.constant 0 : index
    %139 = vector.load %arg17[%c0_55, %c0_56] : memref<8x1xf32, #tpu.memory_space<vmem>>, vector<8x1xf32>
    %140 = vector.broadcast %139 : vector<8x1xf32> to vector<8x256xf32>
    %141 = arith.addf %138, %140 : vector<8x256xf32>
    %142 = arith.subf %141, %2 : vector<8x256xf32>
    %cst_57 = arith.constant 2.000000e+00 : f32
    %143 = vector.broadcast %cst_57 : f32 to vector<8x256xf32>
    %144 = arith.mulf %143, %142 : vector<8x256xf32>
    %c0_58 = arith.constant 0 : index
    %c0_59 = arith.constant 0 : index
    %145 = vector.load %arg21[%c0_58, %c0_59] : memref<32x8xf32, #tpu.memory_space<vmem>>, vector<32x8xf32>
    %cst_60 = arith.constant dense<0.000000e+00> : vector<32x256xf32>
    %146 = tpu.matmul %145, %144, %cst_60 {dimension_numbers = #tpu.dot_dimension_numbers<[1], [0], [0], [1], [0, 0, 1, 1], [], []>} : vector<32x8xf32>, vector<8x256xf32>, vector<32x256xf32> -> vector<32x256xf32>
    %147 = arith.mulf %146, %136 : vector<32x256xf32>
    %c0_61 = arith.constant 0 : index
    %c0_62 = arith.constant 0 : index
    %148 = vector.load %arg20[%c0_61, %c0_62] : memref<32x32xf32, #tpu.memory_space<vmem>>, vector<32x32xf32>
    %cst_63 = arith.constant dense<0.000000e+00> : vector<32x256xf32>
    %149 = tpu.matmul %148, %147, %cst_63 {dimension_numbers = #tpu.dot_dimension_numbers<[1], [0], [0], [1], [0, 0, 1, 1], [], []>} : vector<32x32xf32>, vector<32x256xf32>, vector<32x256xf32> -> vector<32x256xf32>
    %150 = arith.mulf %149, %104 : vector<32x256xf32>
    %c0_64 = arith.constant 0 : index
    %c0_65 = arith.constant 0 : index
    %151 = vector.load %arg19[%c0_64, %c0_65] : memref<32x32xf32, #tpu.memory_space<vmem>>, vector<32x32xf32>
    %cst_66 = arith.constant dense<0.000000e+00> : vector<32x256xf32>
    %152 = tpu.matmul %151, %150, %cst_66 {dimension_numbers = #tpu.dot_dimension_numbers<[1], [0], [0], [1], [0, 0, 1, 1], [], []>} : vector<32x32xf32>, vector<32x256xf32>, vector<32x256xf32> -> vector<32x256xf32>
    %153 = arith.mulf %152, %72 : vector<32x256xf32>
    %c0_67 = arith.constant 0 : index
    %c0_68 = arith.constant 0 : index
    %154 = vector.load %arg18[%c0_67, %c0_68] : memref<8x32xf32, #tpu.memory_space<vmem>>, vector<8x32xf32>
    %cst_69 = arith.constant dense<0.000000e+00> : vector<8x256xf32>
    %155 = tpu.matmul %154, %153, %cst_69 {dimension_numbers = #tpu.dot_dimension_numbers<[1], [0], [0], [1], [0, 0, 1, 1], [], []>} : vector<8x32xf32>, vector<32x256xf32>, vector<8x256xf32> -> vector<8x256xf32>
    %156 = arith.subf %155, %144 : vector<8x256xf32>
    %c0_70 = arith.constant 0 : index
    %c0_71 = arith.constant 0 : index
    %157 = vector.load %arg22[%c0_70, %c0_71] : memref<8x256xf32, #tpu.memory_space<vmem>>, vector<8x256xf32>
    tpu.vector_store %arg22[%c0_70, %c0_71], %156 {strides = array<i32>} : memref<8x256xf32, #tpu.memory_space<vmem>>, vector<8x256xf32>,
    return
  }
  func.func @transform_0(%arg0: i32) -> (i32, i32) {
    %c0_i32 = arith.constant 0 : i32
    %c0_i32_0 = arith.constant 0 : i32
    return %c0_i32, %arg0 : i32, i32
  }
  func.func @transform_1(%arg0: i32) -> (i32, i32) {
    %c0_i32 = arith.constant 0 : i32
    %c0_i32_0 = arith.constant 0 : i32
    return %c0_i32, %arg0 : i32, i32
  }
  func.func @transform_2(%arg0: i32) -> (i32, i32) {
    %c0_i32 = arith.constant 0 : i32
    %c0_i32_0 = arith.constant 0 : i32
    %c0_i32_1 = arith.constant 0 : i32
    return %c0_i32, %c0_i32_0 : i32, i32
  }
  func.func @transform_3(%arg0: i32) -> (i32, i32) {
    %c0_i32 = arith.constant 0 : i32
    %c0_i32_0 = arith.constant 0 : i32
    %c0_i32_1 = arith.constant 0 : i32
    return %c0_i32, %c0_i32_0 : i32, i32
  }
  func.func @transform_4(%arg0: i32) -> (i32, i32) {
    %c0_i32 = arith.constant 0 : i32
    %c0_i32_0 = arith.constant 0 : i32
    %c0_i32_1 = arith.constant 0 : i32
    return %c0_i32, %c0_i32_0 : i32, i32
  }
  func.func @transform_5(%arg0: i32) -> (i32, i32) {
    %c0_i32 = arith.constant 0 : i32
    %c0_i32_0 = arith.constant 0 : i32
    %c0_i32_1 = arith.constant 0 : i32
    return %c0_i32, %c0_i32_0 : i32, i32
  }
  func.func @transform_6(%arg0: i32) -> (i32, i32) {
    %c0_i32 = arith.constant 0 : i32
    %c0_i32_0 = arith.constant 0 : i32
    %c0_i32_1 = arith.constant 0 : i32
    return %c0_i32, %c0_i32_0 : i32, i32
  }
  func.func @transform_7(%arg0: i32) -> (i32, i32) {
    %c0_i32 = arith.constant 0 : i32
    %c0_i32_0 = arith.constant 0 : i32
    %c0_i32_1 = arith.constant 0 : i32
    return %c0_i32, %c0_i32_0 : i32, i32
  }
  func.func @transform_8(%arg0: i32) -> (i32, i32) {
    %c0_i32 = arith.constant 0 : i32
    %c0_i32_0 = arith.constant 0 : i32
    %c0_i32_1 = arith.constant 0 : i32
    return %c0_i32, %c0_i32_0 : i32, i32
  }
  func.func @transform_9(%arg0: i32) -> (i32, i32) {
    %c0_i32 = arith.constant 0 : i32
    %c0_i32_0 = arith.constant 0 : i32
    %c0_i32_1 = arith.constant 0 : i32
    return %c0_i32, %c0_i32_0 : i32, i32
  }
  func.func @transform_10(%arg0: i32) -> (i32, i32) {
    %c0_i32 = arith.constant 0 : i32
    %c0_i32_0 = arith.constant 0 : i32
    %c0_i32_1 = arith.constant 0 : i32
    return %c0_i32, %c0_i32_0 : i32, i32
  }
  func.func @transform_11(%arg0: i32) -> (i32, i32) {
    %c0_i32 = arith.constant 0 : i32
    %c0_i32_0 = arith.constant 0 : i32
    %c0_i32_1 = arith.constant 0 : i32
    return %c0_i32, %c0_i32_0 : i32, i32
  }
  func.func @transform_12(%arg0: i32) -> (i32, i32) {
    %c0_i32 = arith.constant 0 : i32
    %c0_i32_0 = arith.constant 0 : i32
    %c0_i32_1 = arith.constant 0 : i32
    return %c0_i32, %c0_i32_0 : i32, i32
  }
  func.func @transform_13(%arg0: i32) -> (i32, i32) {
    %c0_i32 = arith.constant 0 : i32
    %c0_i32_0 = arith.constant 0 : i32
    %c0_i32_1 = arith.constant 0 : i32
    return %c0_i32, %c0_i32_0 : i32, i32
  }
  func.func @transform_14(%arg0: i32) -> (i32, i32) {
    %c0_i32 = arith.constant 0 : i32
    %c0_i32_0 = arith.constant 0 : i32
    %c0_i32_1 = arith.constant 0 : i32
    return %c0_i32, %c0_i32_0 : i32, i32
  }
  func.func @transform_15(%arg0: i32) -> (i32, i32) {
    %c0_i32 = arith.constant 0 : i32
    %c0_i32_0 = arith.constant 0 : i32
    %c0_i32_1 = arith.constant 0 : i32
    return %c0_i32, %c0_i32_0 : i32, i32
  }
  func.func @transform_16(%arg0: i32) -> (i32, i32) {
    %c0_i32 = arith.constant 0 : i32
    %c0_i32_0 = arith.constant 0 : i32
    %c0_i32_1 = arith.constant 0 : i32
    return %c0_i32, %c0_i32_0 : i32, i32
  }
  func.func @transform_17(%arg0: i32) -> (i32, i32) {
    %c0_i32 = arith.constant 0 : i32
    %c0_i32_0 = arith.constant 0 : i32
    %c0_i32_1 = arith.constant 0 : i32
    return %c0_i32, %c0_i32_0 : i32, i32
  }
  func.func @transform_18(%arg0: i32) -> (i32, i32) {
    %c0_i32 = arith.constant 0 : i32
    %c0_i32_0 = arith.constant 0 : i32
    %c0_i32_1 = arith.constant 0 : i32
    return %c0_i32, %c0_i32_0 : i32, i32
  }
  func.func @transform_19(%arg0: i32) -> (i32, i32) {
    %c0_i32 = arith.constant 0 : i32
    %c0_i32_0 = arith.constant 0 : i32
    %c0_i32_1 = arith.constant 0 : i32
    return %c0_i32, %c0_i32_0 : i32, i32
  }
  func.func @transform_20(%arg0: i32) -> (i32, i32) {
    %c0_i32 = arith.constant 0 : i32
    %c0_i32_0 = arith.constant 0 : i32
    %c0_i32_1 = arith.constant 0 : i32
    return %c0_i32, %c0_i32_0 : i32, i32
  }
  func.func @transform_21(%arg0: i32) -> (i32, i32) {
    %c0_i32 = arith.constant 0 : i32
    %c0_i32_0 = arith.constant 0 : i32
    return %c0_i32, %arg0 : i32, i32
  }
}

</mosaic_0001>

<bundles_post_ra>
// kernel: tpu_custom_call.1
= control target key start
LH: loop header
LB: loop body
LE: loop exit
PB: predicated region body
PF: predicated region fallthrough
CT: control target
= control target key end

     0   :  { %s5199_s0 = inlined_call_operand.vmem [shape: f32[24,512], index: 0, kind: input, shape index: {}]   ;;  %s5200_s1 = inlined_call_operand.vmem [shape: f32[1,512], index: 1, kind: input, shape index: {}]   ;;  %s5201_s2 = inlined_call_operand.vmem [shape: f32[8,1], index: 2, kind: input, shape index: {}]   ;;  %s5202_s3 = inlined_call_operand.vmem [shape: f32[32,8], index: 3, kind: input, shape index: {}]   ;;  %s5203_s4 = inlined_call_operand.vmem [shape: f32[32,8], index: 4, kind: input, shape index: {}]   ;;  %s5204_s5 = inlined_call_operand.vmem [shape: f32[32,1], index: 5, kind: input, shape index: {}]   ;;  %s5205_s6 = inlined_call_operand.vmem [shape: f32[16,32], index: 6, kind: input, shape index: {}]   ;;  %s5206_s7 = inlined_call_operand.vmem [shape: f32[16,1], index: 7, kind: input, shape index: {}]   ;;  %s5207_s8 = inlined_call_operand.vmem [shape: f32[32,24], index: 8, kind: input, shape index: {}]   ;;  %s5208_s9 = inlined_call_operand.vmem [shape: f32[32,16], index: 9, kind: input, shape index: {}]   ;;  %s5209_s10 = inlined_call_operand.vmem [shape: f32[32,1], index: 10, kind: input, shape index: {}]   ;;  %s5210_s11 = inlined_call_operand.vmem [shape: f32[32,32], index: 11, kind: input, shape index: {}]   ;;  %s5211_s12 = inlined_call_operand.vmem [shape: f32[32,1], index: 12, kind: input, shape index: {}]   ;;  %s5212_s13 = inlined_call_operand.vmem [shape: f32[32,32], index: 13, kind: input, shape index: {}]   ;;  %s5213_s14 = inlined_call_operand.vmem [shape: f32[32,1], index: 14, kind: input, shape index: {}]   ;;  %s5214_s15 = inlined_call_operand.vmem [shape: f32[8,32], index: 15, kind: input, shape index: {}]   ;;  %s5215_s16 = inlined_call_operand.vmem [shape: f32[8,1], index: 16, kind: input, shape index: {}]   ;;  %s5216_s17 = inlined_call_operand.vmem [shape: f32[8,32], index: 17, kind: input, shape index: {}]   ;;  %s5217_s18 = inlined_call_operand.vmem [shape: f32[32,32], index: 18, kind: input, shape index: {}]   ;;  %s5218_s19 = inlined_call_operand.vmem [shape: f32[32,32], index: 19, kind: input, shape index: {}]   ;;  %s5219_s20 = inlined_call_operand.vmem [shape: f32[32,8], index: 20, kind: input, shape index: {}]   ;;  %s5220_s21 = inlined_call_operand.hbm [shape: f32[8,512], index: 21, kind: output, shape index: {}]  }
   0x1   :  { %5232 = sst [smem:[#allocation12_spill]] %s5199_s0 }
   0x2   :  { %5233 = sst [smem:[#allocation13_spill]] %s5200_s1 }
   0x3   :  { %5234 = sst [smem:[#allocation14_spill]] %s5201_s2 }
   0x4   :  { %5235 = sst [smem:[#allocation15_spill]] %s5202_s3 }
   0x5   :  { %5236 = sst [smem:[#allocation16_spill]] %s5203_s4 }
   0x6   :  { %5237 = sst [smem:[#allocation17_spill]] %s5204_s5 }
   0x7   :  { %5238 = sst [smem:[#allocation18_spill]] %s5205_s6 }
   0x8   :  { %5239 = sst [smem:[#allocation19_spill]] %s5206_s7 }
   0x9   :  { %26 = vsyncpa [#allocation4], 0 }
   0xa   :  { %28 = vsyncpa [#allocation4 + $0x1], 0  ;;  %s3998_s2 = smov 0   ;;  %s4000_s25 = smov 0  }
   0xb   :  { %s4002_s26 = smov 0   ;;  %s4004_s27 = smov 0  }
   0xc LB: > { %5240 = sst [smem:[#allocation6_spill]] %s3865_s2  ;;  %s4019_s3 = sadd.s32 4294967295, %s3877_s27   ;;  %s3877_s27 = sphi %s4004_s27, %s5315_s27   ;;  %s3873_s26 = sphi %s4002_s26, %s5317_s26   ;;  %s3869_s25 = sphi %s4000_s25, %s5319_s25   ;;  %s3865_s2 = sphi %s3998_s2, %s5318_s2  }
   0xd   : > { %5241 = sst [smem:[#allocation7_spill]] %s3873_s26  ;;  %s3437_s28 = sadd.s32 4294967294, %s3877_s27  }
   0xe   : > { %5242 = sst [smem:[#allocation8_spill]] %s3877_s27  ;;  %s4023_s29 = sadd.s32 1, %s3877_s27  }
   0xf   : > { %5243 = sst [smem:[#allocation9_spill]] %s4023_s29  ;;  %s41_s0 = sadd.s32 1, %s3873_s26 }
  0x10   : > { %s38_s4 = ssub.s32 %s3877_s27, %s4023_s29  ;;  %p48_p0 = scmp.ne.s32.totalorder %s3873_s26, %s3869_s25 }
  0x11   : > { %p39_p1 = scmp.eq.s32.totalorder %s38_s4, 0  ;;  %p49_p2 = scmp.eq.s32.totalorder %s3877_s27, 0 }
  0x12   : > { %p503_p3 = scmp.eq.s32.totalorder %s4019_s3, 1  ;;  %p508_p4 = scmp.ne.s32.totalorder %s3869_s25, %s3865_s2 }
  0x13   : > { %s4035_s30 = scalar_select %p39_p1, %s3873_s26, %s41_s0  }
  0x14   : > { %p50_p5 = por %p49_p2, %p48_p0  ;;  %p4037_p6 = por %p503_p3, %p48_p0 }
  0x15   : > { %5244 = sst [smem:[#allocation10_spill]] %s4035_s30  ;;  %p509_p7 = scmp.eq.s32.totalorder %s3437_s28, 1 }
  0x16   : > { %p5231_p9 = scmp.ge.s32.totalorder %s3877_s27, 2 }
  0x17   : > { %p4041_p8 = por %p509_p7, %p508_p4 }
  0x18   : > { %582 = sbr.rel (%p5231_p9) target bundleno = 42 (0x2a), region = 92 }
  0x19   : > { %s5246_s22 = scalar_select %p4041_p8, 1, 0 }
  0x1b   : > { %5247 = sst [smem:[#allocation11_spill]] %s5246_s22 }
  0x1d   : > { %585 = sbr.rel (!%p50_p5) target bundleno = 42 (0x2a), region = 96  ;;  %s587_s23 = sand.u32 (%p50_p5), 1, %s3873_s26  }
  0x1e   : > { %s3506_s1 = sshll.u32 (%p50_p5), %s3877_s27, 4  ;;  %s3508_s24 = smul.u32 (%p50_p5), 48, %s587_s23 }
  0x1f   : > { %s5248_s30 = sld [smem:[#allocation12_spill]] (%p50_p5) }
  0x20   : > { %s589_s28 = scalar_lea.vmem (%p50_p5), [#allocation2], %s3508_s24 }
  0x25   : > { %s592_s29 = scalar_lea.vmem %s5248_s30, %s3506_s1 }
  0x26   : > { %v605_v0 = vld [vmem:[%s592_s29] sm:$0xff]  ;;  %v607_v1 = vld [vmem:[%s592_s29 + $0x8] sm:$0xff] }
  0x27   : > { %v609_v2 = vld [vmem:[%s592_s29 + $0x20] sm:$0xff]  ;;  %v611_v3 = vld [vmem:[%s592_s29 + $0x28] sm:$0xff]  ;;  %606 = vst [vmem:[%s589_s28] sm:$0xff] %v605_v0  ;;  %608 = vst [vmem:[%s589_s28 + $0x8] sm:$0xff] %v607_v1 }
  0x28   : > { %v613_v4 = vld [vmem:[%s592_s29 + $0x40] sm:$0xff]  ;;  %v615_v5 = vld [vmem:[%s592_s29 + $0x48] sm:$0xff]  ;;  %610 = vst [vmem:[%s589_s28 + $0x10] sm:$0xff] %v609_v2  ;;  %612 = vst [vmem:[%s589_s28 + $0x18] sm:$0xff] %v611_v3 }
  0x29   : > { %614 = vst [vmem:[%s589_s28 + $0x20] sm:$0xff] %v613_v4  ;;  %616 = vst [vmem:[%s589_s28 + $0x28] sm:$0xff] %v615_v5 }
  0x2a PF: > { %p3442_p10 = scmp.ge.s32.totalorder %s3877_s27, 1  ;;  %p629_p11 = scmp.lt.s32.totalorder %s3877_s27, 3 }
  0x2c   : > { %p630_p12 = pnand %p3442_p10, %p629_p11 }
  0x2d   : > { %s5249_s1 = sld [smem:[#allocation14_spill]] (!%p630_p12)  ;;  %s4396_s26 = sand.u32 (!%p630_p12), 1, %s3869_s25  }
  0x2e   : > { %633 = sbr.rel (%p630_p12) target bundleno = 2648 (0xa58), region = 123  ;;  %s5250_s0 = sld [smem:[#allocation17_spill]] (!%p630_p12) }
  0x2f   : > { %s5251_s7 = sld [smem:[#allocation19_spill]] (!%p630_p12)  ;;  %s3443_s24 = sshll.u32 (!%p630_p12), %s4396_s26, 4 }
  0x30   : > { %s5252_s23 = sld [smem:[#allocation13_spill]] (!%p630_p12)  ;;  %s3507_s4 = sshll.u32 (!%p630_p12), %s4019_s3, 8 }
  0x31   : > { %s5253_s22 = sld [smem:[#allocation16_spill]] (!%p630_p12)  ;;  %s3349_s29 = scalar_lea.sflag (!%p630_p12), [#allocation4], %s4396_s26 }
  0x32   : > { %s5254_s27 = sld [smem:[#allocation15_spill]] (!%p630_p12) }
  0x33   : > { %v713_v6 = vld [vmem:[%s5249_s1] sm:$0xff]  ;;  %v3879_v7 = vmov 0   ;;  %v1861_v11 = vld [vmem:[%s5209_s10 + $0x10] sm:$0xff]  ;;  %v3880_v17 = vmov 0.0   ;;  %s3444_s1 = sshll.u32 %s4019_s3, 1  ;;  %v720_v19 = vlaneseq  ;;  %v1862_v25 = vld [vmem:[%s5209_s10 + $0x18] sm:$0xff] }
  0x34   : > { %3565 = vset.pattern.permute.xlu0 %v3879_v7  ;;  %3566 = vset.pattern.permute.xlu1 %v3879_v7  ;;  %v1360_v8 = vld [vmem:[%s5250_s0 + $0x18] sm:$0xff]  ;;  %v1357_v9 = vld [vmem:[%s5250_s0] sm:$0xff]  ;;  %v2129_v13 = vld [vmem:[%s5211_s12 + $0x10] sm:$0xff]  ;;  %p701_p13 = scmp.lt.s32.totalorder %s3444_s1, 3  ;;  %v3881_v60 = vmov 2102212464  }
  0x35   : > { %716 = vperm.xlu0 %3565, %v713_v6   ;;  %v1551_v10 = vld [vmem:[%s5251_s7] sm:$0xff]  ;;  %v2490_v15 = vld [vmem:[%s5213_s14 + $0x10] sm:$0xff]  ;;  %1231 = vmatprep.mubr.f32.mxu0 %v3880_v17  ;;  %v1358_v20 = vld [vmem:[%s5250_s0 + $0x8] sm:$0xff]  ;;  %v721_v21 = vshrl.u32 %v720_v19, 7  ;;  %v3882_v62 = vmov 920167782  }
  0x36   : > { %v1859_v12 = vld [vmem:[%s5209_s10] sm:$0xff]  ;;  %1332 = vmatprep.mubr.f32.mxu1 %v3880_v17  ;;  %v1359_v18 = vld [vmem:[%s5250_s0 + $0x10] sm:$0xff]  ;;  %s5321_s1 = smov (!%p701_p13, %s3444_s1), 3  ;;  %v1552_v22 = vld [vmem:[%s5251_s7 + $0x8] sm:$0xff]  ;;  %v3883_v1 = vmov 683565275  }
  0x37   : > { %v2127_v14 = vld [vmem:[%s5211_s12] sm:$0xff]  ;;  %1373 = vperm.xlu1 %3566, %v1359_v18   ;;  %s703_s2 = scalar_lea.vmem %s5252_s23, %s5321_s1  ;;  %v722_v23 = vsub.s32 0, %v721_v21  ;;  %v726_v24 = vsub.s32 1, %v721_v21  ;;  %v1860_v29 = vld [vmem:[%s5209_s10 + $0x8] sm:$0xff]  ;;  %v2130_v33 = vld [vmem:[%s5211_s12 + $0x18] sm:$0xff]  ;;  %s5266_s6 = sld [smem:[#allocation18_spill]] }
  0x38   : > { %v2488_v16 = vld [vmem:[%s5213_s14] sm:$0xff]  ;;  %v2128_v40 = vld [vmem:[%s5211_s12 + $0x8] sm:$0xff]  ;;  %v2491_v47 = vld [vmem:[%s5213_s14 + $0x18] sm:$0xff]  ;;  %v3884_v4 = vmov 1326507024   ;;  %s5255_s30 = smov %s5254_s27  ;;  %s3887_s3 = smov [#allocation3]  }
  0x39   : > { %1378 = vperm.xlu0 %3565, %v1360_v8   ;;  %v712_v26 = vld [vmem:[%s703_s2] sm:$0x3]  ;;  %v2489_v54 = vld [vmem:[%s5213_s14 + $0x8] sm:$0xff]  ;;  %v3885_v6 = vmov 2475754826  }
  0x3a   : > { %v723_v27 = vrot.slane %v712_v26, %v722_v23  ;;  %v727_v28 = vrot.slane %v712_v26, %v726_v24  ;;  %v3886_v8 = vmov 2131351028  }
  0x3b   : > { %1368 = vperm.xlu1 %3566, %v1358_v20  }
  0x3d   : > { %1363 = vperm.xlu0 %3565, %v1357_v9  }
  0x3f   : > { %1560 = vperm.xlu1 %3566, %v1552_v22  }
  0x41   : > { %1555 = vperm.xlu0 %3565, %v1551_v10   ;;  %v2846_v10 = vld [vmem:[%s5215_s16] sm:$0xff] }
  0x43   : > { %1880 = vperm.xlu1 %3566, %v1862_v25  }
  0x45   : > { %1875 = vperm.xlu0 %3565, %v1861_v11  }
  0x47   : > { %1870 = vperm.xlu1 %3566, %v1860_v29  }
  0x49   : > { %1865 = vperm.xlu0 %3565, %v1859_v12  }
  0x4b   : > { %2148 = vperm.xlu1 %3566, %v2130_v33  }
  0x4d   : > { %2143 = vperm.xlu0 %3565, %v2129_v13  }
  0x4f   : > { %2138 = vperm.xlu1 %3566, %v2128_v40  }
  0x51   : > { %2133 = vperm.xlu0 %3565, %v2127_v14  }
  0x53   : > { %2509 = vperm.xlu1 %3566, %v2491_v47  }
  0x55   : > { %2504 = vperm.xlu0 %3565, %v2490_v15  }
  0x57   : > { %2499 = vperm.xlu1 %3566, %v2489_v54  }
  0x59   : > { %2494 = vperm.xlu0 %3565, %v2488_v16  }
  0x5b   : > { %2849 = vperm.xlu1 %3566, %v2846_v10  }
  0xb0   : > { %v717_v30 = vpop.permute.xlu0 %716 }
  0xb1   : > { %v4106_v31 = vmul.f32 %v723_v27, %v717_v30  ;;  %v4108_v32 = vmul.f32 %v727_v28, %v717_v30 }
  0xb3   : > { %v735_v34 = vand.u32 2139095040, %v4106_v31  ;;  %v839_v35 = vand.u32 2139095040, %v4108_v32  ;;  %v836_v36 = vand.u32 2147483647, %v4108_v32  ;;  %v732_v37 = vand.u32 2147483647, %v4106_v31 }
  0xb4   : > { %vm838_vm14 = vcmp.lt.s32.totalorder %v4108_v32, 0 }
  0xb5   : > { %v736_v38 = vshrl.u32 %v735_v34, 23  ;;  %v840_v39 = vshrl.u32 %v839_v35, 23  ;;  %v843_v41 = vand.u32 8388607, %v836_v36  ;;  %v739_v44 = vand.u32 8388607, %v732_v37 }
  0xb6   : > { %vm837_vm15 = vcmp.le.f32.partialorder %v836_v36, 0.7853982 }
  0xb7   : > { %v3445_v42 = vadd.s32 4294967169, %v736_v38  ;;  %v3449_v43 = vadd.s32 4294967169, %v840_v39  ;;  %v844_v48 = vor.u32 8388608, %v843_v41  ;;  %v740_v49 = vor.u32 8388608, %v739_v44 }
  0xb9   : > { %v742_v45 = vadd.s32 1, %v3445_v42  ;;  %v846_v46 = vadd.s32 1, %v3449_v43  ;;  %v4132_v55 = vshll.u32 %v844_v48, 8  ;;  %v4139_v59 = vshll.u32 %v740_v49, 8 }
  0xbb   : > { %vm743_vm0 = vcmp.gt.s32.totalorder %v742_v45, 0  ;;  %vm847_vm1 = vcmp.gt.s32.totalorder %v846_v46, 0 }
  0xbc   : > { %v744_v50 = vsel %vm743_vm0, %v742_v45, 0  ;;  %v848_v51 = vsel %vm847_vm1, %v846_v46, 0  ;;  %vm734_vm0 = vcmp.lt.s32.totalorder %v4106_v31, 0  ;;  %vm733_vm1 = vcmp.le.f32.partialorder %v732_v37, 0.7853982 }
  0xbd   : > { %v4127_v52 = vand.u32 31, %v744_v50  ;;  %v850_v53 = vand.u32 31, %v848_v51  ;;  %v4134_v56 = vshrl.u32 %v744_v50, 5  ;;  %v849_v58 = vshrl.u32 %v848_v51, 5 }
  0xbf   : > { %v4137_v57 = vsub.s32 32, %v4127_v52  ;;  %v758_v61 = vshll.u32 %v3881_v60, %v4127_v52  ;;  %v761_v63 = vshll.u32 %v3882_v62, %v4127_v52  ;;  %v851_v0 = vsub.s32 32, %v850_v53 }
  0xc0   : > { %v853_v2 = vshll.u32 %v3883_v1, %v850_v53  ;;  %v856_v7 = vshll.u32 %v3885_v6, %v850_v53  ;;  %v859_v9 = vshll.u32 %v3886_v8, %v850_v53  ;;  %v862_v14 = vshll.u32 %v3881_v60, %v850_v53 }
  0xc1   : > { %v759_v3 = vshrl.u32 %v3882_v62, %v4137_v57  ;;  %v762_v5 = vshrl.u32 %v3884_v4, %v4137_v57  ;;  %v854_v11 = vshrl.u32 %v3885_v6, %v851_v0  ;;  %v857_v12 = vshrl.u32 %v3886_v8, %v851_v0 }
  0xc2   : > { %v860_v13 = vshrl.u32 %v3881_v60, %v851_v0  ;;  %v852_v15 = vshrl.u32 %v3883_v1, %v851_v0  ;;  %v863_v16 = vshrl.u32 %v3882_v62, %v851_v0  ;;  %v865_v18 = vshll.u32 %v3882_v62, %v850_v53 }
  0xc3   : > { %v866_v19 = vshrl.u32 %v3884_v4, %v851_v0  ;;  %v760_v20 = vor.u32 %v759_v3, %v758_v61  ;;  %v855_v21 = vor.u32 %v854_v11, %v853_v2  ;;  %v858_v22 = vor.u32 %v857_v12, %v856_v7 }
  0xc4   : > { %v861_v23 = vor.u32 %v860_v13, %v859_v9  ;;  %v763_v24 = vor.u32 %v762_v5, %v761_v63  ;;  %v864_v25 = vor.u32 %v863_v16, %v862_v14  ;;  %vm868_vm2 = vcmp.lt.s32.totalorder %v849_v58, 1 }
  0xc5   : > { %v867_v26 = vor.u32 %v866_v19, %v865_v18  ;;  %vm767_vm3 = vcmp.lt.s32.totalorder %v4134_v56, 4  ;;  %vm870_vm4 = vcmp.lt.s32.totalorder %v849_v58, 3  ;;  %vm871_vm5 = vcmp.lt.s32.totalorder %v849_v58, 4 }
  0xc6   : > { %v872_v27 = vsel %vm868_vm2, %v852_v15, %v855_v21  ;;  %v873_v28 = vsel %vm871_vm5, %v861_v23, 2102212464  ;;  %v876_v29 = vsel %vm868_vm2, %v855_v21, %v858_v22  ;;  %v877_v30 = vsel %vm871_vm5, %v864_v25, 920167782 }
  0xc7   : > { %v880_v33 = vsel %vm868_vm2, %v858_v22, %v861_v23  ;;  %vm869_vm6 = vcmp.lt.s32.totalorder %v849_v58, 2  ;;  %v874_v34 = vsel %vm870_vm4, %v858_v22, %v873_v28  ;;  %v878_v35 = vsel %vm870_vm4, %v861_v23, %v877_v30 }
  0xc8   : > { %v881_v38 = vsel %vm871_vm5, %v867_v26, 1326507024  ;;  %v773_v39 = vsel %vm767_vm3, %v760_v20, 920167782  ;;  %v777_v40 = vsel %vm767_vm3, %v763_v24, 1326507024  ;;  %v879_v41 = vsel %vm869_vm6, %v876_v29, %v878_v35 }
  0xc9   : > { %v882_v42 = vsel %vm870_vm4, %v864_v25, %v881_v38  ;;  %v875_v43 = vsel %vm869_vm6, %v872_v27, %v874_v34  ;;  %v4154_v45 = vmul.u32.u64.low %v4132_v55, %v879_v41  ;;  %v4155_v46 = vmul.u32.u64.high %v4132_v55, %v879_v41, %v4154_v45 }
  0xca   : > { %v883_v44 = vsel %vm869_vm6, %v880_v33, %v882_v42  ;;  %v749_v49 = vshll.u32 %v3883_v1, %v4127_v52  ;;  %v750_v50 = vshrl.u32 %v3885_v6, %v4137_v57  ;;  %v752_v51 = vshll.u32 %v3885_v6, %v4127_v52 }
  0xcb   : > { %v4158_v47 = vmul.u32.u64.low %v4132_v55, %v883_v44  ;;  %v4159_v48 = vmul.u32.u64.high %v4132_v55, %v883_v44, %v4158_v47  ;;  %v753_v53 = vshrl.u32 %v3886_v8, %v4137_v57  ;;  %v755_v54 = vshll.u32 %v3886_v8, %v4127_v52 }
  0xcc   : > { %v756_v58 = vshrl.u32 %v3881_v60, %v4137_v57  ;;  %v891_v61 = vmul.u32 %v4132_v55, %v875_v43  ;;  %v748_v62 = vshrl.u32 %v3883_v1, %v4137_v57  ;;  %v751_v63 = vor.u32 %v750_v50, %v749_v49 }
  0xcd   : > { %vm764_vm7 = vcmp.lt.s32.totalorder %v4134_v56, 1  ;;  %v894_v0 = vadd.s32 1, %v4155_v46  ;;  %v754_v2 = vor.u32 %v753_v53, %v752_v51  ;;  %vm766_vm8 = vcmp.lt.s32.totalorder %v4134_v56, 3 }
  0xce   : > { %v757_v3 = vor.u32 %v756_v58, %v755_v54  ;;  %vm893_vm9 = vc.u32 %v4159_v48, %v4154_v45  ;;  %vm765_vm10 = vcmp.lt.s32.totalorder %v4134_v56, 2  ;;  %v768_v52 = vsel %vm764_vm7, %v748_v62, %v751_v63 }
  0xcf   : > { %v778_v60 = vsel %vm766_vm8, %v760_v20, %v777_v40  ;;  %v895_v55 = vsel %vm893_vm9, %v894_v0, %v4155_v46  ;;  %v772_v1 = vsel %vm764_vm7, %v751_v63, %v754_v2  ;;  %v892_v35 = vadd.s32 %v4154_v45, %v4159_v48 }
  0xd0   : > { %v769_v57 = vsel %vm767_vm3, %v757_v3, 2102212464  ;;  %v774_v4 = vsel %vm766_vm8, %v757_v3, %v773_v39  ;;  %v896_v5 = vadd.s32 %v895_v55, %v891_v61  ;;  %v776_v8 = vsel %vm764_vm7, %v754_v2, %v757_v3 }
  0xd1   : > { %v770_v6 = vsel %vm766_vm8, %v754_v2, %v769_v57  ;;  %v775_v7 = vsel %vm765_vm10, %v772_v1, %v774_v4  ;;  %v779_v9 = vsel %vm765_vm10, %v776_v8, %v778_v60  ;;  %vm928_vm8 = vweird.f32 %v4108_v32 }
  0xd2   : > { %v4184_v10 = vmul.u32.u64.low %v4139_v59, %v775_v7  ;;  %v4185_v11 = vmul.u32.u64.high %v4139_v59, %v775_v7, %v4184_v10  ;;  %v897_v12 = vadd.s32 536870912, %v896_v5  ;;  %v771_v15 = vsel %vm765_vm10, %v768_v52, %v770_v6 }
  0xd3   : > { %v4188_v13 = vmul.u32.u64.low %v4139_v59, %v779_v9  ;;  %v4189_v14 = vmul.u32.u64.high %v4139_v59, %v779_v9, %v4188_v13  ;;  %v787_v20 = vmul.u32 %v4139_v59, %v771_v15 }
  0xd4   : > { %v898_v16 = vshrl.u32 %v897_v12, 30  ;;  %v790_v18 = vadd.s32 1, %v4185_v11 }
  0xd5   : > { %vm789_vm11 = vc.u32 %v4189_v14, %v4184_v10  ;;  %v788_v54 = vadd.s32 %v4184_v10, %v4189_v14 }
  0xd6   : > { %v899_v19 = vshll.u32 %v898_v16, 30  ;;  %v791_v56 = vsel %vm789_vm11, %v790_v18, %v4185_v11  ;;  %v922_v2 = vsub.s32 4, %v898_v16 }
  0xd7   : > { %v792_v22 = vadd.s32 %v791_v56, %v787_v20 }
  0xd8   : > { %v900_v21 = vsub.s32 %v896_v5, %v899_v19  ;;  %v923_v1 = vsel %vm838_vm14, %v922_v2, %v898_v16 }
  0xd9   : > { %v793_v24 = vadd.s32 536870912, %v792_v22  ;;  %v925_v7 = vsel %vm837_vm15, 0, %v923_v1 }
  0xda   : > { %v902_v23 = vsub.s32 0, %v900_v21  ;;  %v929_v10 = vadd.s32 3, %v925_v7  ;;  %v1136_v13 = vand.u32 3, %v925_v7 }
  0xdb   : > { %v794_v26 = vshrl.u32 %v793_v24, 30 }
  0xdc   : > { %v3450_v25 = vmin.u32 %v902_v23, %v900_v21  ;;  %v930_v14 = vand.u32 3, %v929_v10  ;;  %vm1138_vm2 = vcmp.eq.s32.totalorder %v1136_v13, 0  ;;  %vm1141_vm3 = vcmp.eq.s32.totalorder %v1136_v13, 2 }
  0xdd   : > { %v795_v28 = vshll.u32 %v794_v26, 30  ;;  %v818_v9 = vsub.s32 4, %v794_v26  ;;  %vm1137_vm6 = vcmp.lt.s32.totalorder %v1136_v13, 2 }
  0xde   : > { %v904_v27 = vclz %v3450_v25  ;;  %vm935_vm4 = vcmp.eq.s32.totalorder %v930_v14, 2  ;;  %vm932_vm5 = vcmp.eq.s32.totalorder %v930_v14, 0  ;;  %vm931_vm7 = vcmp.lt.s32.totalorder %v930_v14, 2 }
  0xdf   : > { %v796_v30 = vsub.s32 %v792_v22, %v795_v28  ;;  %v819_v12 = vsel %vm734_vm0, %v818_v9, %v794_v26 }
  0xe0   : > { %v3451_v29 = vadd.s32 4294967294, %v904_v27  ;;  %v821_v16 = vsel %vm733_vm1, 0, %v819_v12 }
  0xe1   : > { %v798_v34 = vsub.s32 0, %v796_v30  ;;  %v825_v37 = vadd.s32 3, %v821_v16  ;;  %v1033_v28 = vand.u32 3, %v821_v16 }
  0xe2   : > { %vm3452_vm12 = vcmp.lt.s32.totalorder %v3451_v29, 0 }
  0xe3   : > { %v907_v33 = vsel %vm3452_vm12, 0, %v3451_v29  ;;  %v3446_v39 = vmin.u32 %v798_v34, %v796_v30  ;;  %v826_v29 = vand.u32 3, %v825_v37  ;;  %vm1038_vm9 = vcmp.eq.s32.totalorder %v1033_v28, 2 }
  0xe4   : > { %v908_v59 = vsub.s32 32, %v907_v33  ;;  %v912_v38 = vsub.s32 4294967266, %v907_v33  ;;  %v909_v40 = vshll.u32 %v900_v21, %v907_v33  ;;  %vm1035_vm11 = vcmp.eq.s32.totalorder %v1033_v28, 0 }
  0xe5   : > { %v800_v43 = vclz %v3446_v39  ;;  %vm831_vm10 = vcmp.eq.s32.totalorder %v826_v29, 2  ;;  %vm828_vm12 = vcmp.eq.s32.totalorder %v826_v29, 0 }
  0xe6   : > { %v910_v41 = vshrl.u32 %v892_v35, %v908_v59  ;;  %v913_v42 = vadd.s32 127, %v912_v38 }
  0xe7   : > { %v3447_v47 = vadd.s32 4294967294, %v800_v43  ;;  %v1146_v43 = vld [vmem:[%s5254_s27] sm:$0xff]  ;;  %s3509_s27 = smul.u32 48, %s4396_s26 }
  0xe8   : > { %v911_v44 = vor.u32 %v910_v41, %v909_v40  ;;  %v914_v46 = vshll.u32 %v913_v42, 23  ;;  %v1150_v42 = vld [vmem:[%s5253_s22] sm:$0xff] }
  0xe9   : > { %vm3448_vm13 = vcmp.lt.s32.totalorder %v3447_v47, 0  ;;  %s4399_s23 = scalar_lea.vmem [#allocation2], %s3509_s27  ;;  %s3361_s27 = scalar_lea.hbm %s5220_s21, %s3507_s4 }
  0xea   : > { %v915_v49 = vor.u32 4788187, %v914_v46  ;;  %v918_v51 = vcvt.s32.f32 %v911_v44  ;;  %v803_v53 = vsel %vm3448_vm13, 0, %v3447_v47  ;;  %vm1034_vm13 = vcmp.lt.s32.totalorder %v1033_v28, 2  ;;  %v1147_v47 = vld [vmem:[%s5255_s30 + $0x8] sm:$0xff] }
  0xeb   : > { %v804_v58 = vsub.s32 32, %v803_v53  ;;  %v808_v61 = vsub.s32 4294967266, %v803_v53  ;;  %v805_v48 = vshll.u32 %v796_v30, %v803_v53  ;;  %v1149_v53 = vld [vmem:[%s5255_s30 + $0x18] sm:$0xff] }
  0xec   : > { %v916_v50 = vand.u32 2147483647, %v915_v49  ;;  %v1152_v49 = vld [vmem:[%s5253_s22 + $0x10] sm:$0xff] }
  0xed   : > { %v806_v62 = vshrl.u32 %v788_v54, %v804_v58  ;;  %v809_v63 = vadd.s32 127, %v808_v61  ;;  %v1379_v54 = vpop.permute.xlu0 %1378 }
  0xee   : > { %v919_v45 = vmul.f32 %v918_v51, %v916_v50  ;;  %v1148_v50 = vld [vmem:[%s5255_s30 + $0x10] sm:$0xff]  ;;  %v1153_v51 = vld [vmem:[%s5253_s22 + $0x18] sm:$0xff] }
  0xef   : > { %v807_v3 = vor.u32 %v806_v62, %v805_v48  ;;  %v810_v52 = vshll.u32 %v809_v63, 23  ;;  %v1374_v48 = vpop.permute.xlu1 %1373 }
  0xf0   : > { %v920_v0 = vxor.u32 2147483648, %v919_v45 }
  0xf1   : > { %v811_v57 = vor.u32 4788187, %v810_v52  ;;  %v814_v5 = vcvt.s32.f32 %v807_v3 }
  0xf2   : > { %v921_v60 = vsel %vm838_vm14, %v920_v0, %v919_v45  ;;  %vm827_vm14 = vcmp.lt.s32.totalorder %v826_v29, 2  ;;  %v1364_v45 = vpop.permute.xlu0 %1363 }
  0xf3   : > { %v924_v55 = vsel %vm837_vm15, %v4108_v32, %v921_v60  ;;  %v812_v4 = vand.u32 2147483647, %v811_v57  ;;  %vm824_vm15 = vweird.f32 %v4106_v31 }
  0xf4   : > { %3567 = vcosq.f32 %v924_v55 }
  0xf5   : > { %3569 = vsinq.f32 %v924_v55  ;;  %v815_v6 = vmul.f32 %v814_v5, %v812_v4 }
  0xf7   : > { %v816_v8 = vxor.u32 2147483648, %v815_v6 }
  0xf9   : > { %v817_v36 = vsel %vm734_vm0, %v816_v8, %v815_v6  ;;  %vm1154_vm0 = vcmask 64512   ;;  %v1369_v6 = vpop.permute.xlu1 %1368 }
  0xfa   : > { %v820_v11 = vsel %vm733_vm1, %v4106_v31, %v817_v36  ;;  %v1151_v31 = vld [vmem:[%s5253_s22 + $0x8] sm:$0xff] }
  0xfb   : > { %3571 = vcosq.f32 %v820_v11 }
  0xfc   : > { %3573 = vsinq.f32 %v820_v11 }
 0x101   : > { %v3568_v15 = vpop.eup %3567 }
 0x102   : > { %v3570_v18 = vpop.eup %3569  ;;  %v936_v19 = vxor.u32 2147483648, %v3568_v15 }
 0x103   : > { %v933_v20 = vxor.u32 2147483648, %v3570_v18 }
 0x104   : > { %v1143_v56 = vsel %vm1141_vm3, %v936_v19, %v3570_v18  ;;  %v937_v21 = vsel %vm935_vm4, %v936_v19, %v3570_v18 }
 0x105   : > { %v1140_v22 = vsel %vm1138_vm2, %v3568_v15, %v933_v20  ;;  %v934_v23 = vsel %vm932_vm5, %v3568_v15, %v933_v20 }
 0x106   : > { %v1144_v24 = vsel %vm1137_vm6, %v1140_v22, %v1143_v56  ;;  %v938_v25 = vsel %vm931_vm7, %v934_v23, %v937_v21 }
 0x107   : > { %v1145_v26 = vsel %vm928_vm8, nan, %v1144_v24  ;;  %v939_v27 = vsel %vm928_vm8, nan, %v938_v25 }
 0x108   : > { %1197 = vmatprep.subr.mxu0 %v1145_v26  ;;  %1298 = vmatprep.subr.mxu1 %v939_v27  ;;  %v3572_v30 = vpop.eup %3571 }
 0x109   : > { %v3574_v33 = vpop.eup %3573  ;;  %v832_v34 = vxor.u32 2147483648, %v3572_v30 }
 0x10a   : > { %v829_v35 = vxor.u32 2147483648, %v3574_v33 }
 0x10b   : > { %v1040_v59 = vsel %vm1038_vm9, %v832_v34, %v3574_v33  ;;  %v833_v38 = vsel %vm831_vm10, %v832_v34, %v3574_v33 }
 0x10c   : > { %v1037_v32 = vsel %vm1035_vm11, %v3572_v30, %v829_v35  ;;  %v830_v39 = vsel %vm828_vm12, %v3572_v30, %v829_v35 }
 0x10d   : > { %v1041_v40 = vsel %vm1034_vm13, %v1037_v32, %v1040_v59  ;;  %v834_v41 = vsel %vm827_vm14, %v830_v39, %v833_v38 }
 0x10e   : > { %v1042_v44 = vsel %vm824_vm15, nan, %v1041_v40  ;;  %v835_v46 = vsel %vm824_vm15, nan, %v834_v41 }
 0x10f   : > { %1198 = vmatpush1.msra.mxu0 %v1042_v44  ;;  %1299 = vmatpush1.msra.mxu1 %v835_v46 }
 0x110   : > { %3461 = vmatmul.mubr.msk.f32.vlgmr.msra.gmra.mxu0 %vm1154_vm0, %v1150_v42  ;;  %3465 = vmatmul.mubr.msk.f32.vlgmr.msra.gmra.mxu1 %vm1154_vm0, %v1146_v43 }
 0x111   : > { %1237 = vmatprep.mubr.f32.mxu0 %v3880_v17  ;;  %1338 = vmatprep.mubr.f32.mxu1 %v3880_v17 }
 0x114   : > { %3462 = vmatmul.mubr.msk.f32.gmra.mxu0 %vm1154_vm0, %v1151_v31  ;;  %3466 = vmatmul.mubr.msk.f32.gmra.mxu1 %vm1154_vm0, %v1147_v47 }
 0x115   : > { %1243 = vmatprep.mubr.f32.mxu0 %v3880_v17  ;;  %1344 = vmatprep.mubr.f32.mxu1 %v3880_v17 }
 0x118   : > { %3463 = vmatmul.mubr.msk.f32.gmra.mxu0 %vm1154_vm0, %v1152_v49  ;;  %3467 = vmatmul.mubr.msk.f32.gmra.mxu1 %vm1154_vm0, %v1148_v50 }
 0x119   : > { %1249 = vmatprep.mubr.f32.mxu0 %v3880_v17  ;;  %1350 = vmatprep.mubr.f32.mxu1 %v3880_v17 }
 0x11c   : > { %3464 = vmatmul.mubr.msk.f32.gmra.mxu0 %vm1154_vm0, %v1153_v51  ;;  %3468 = vmatmul.mubr.msk.f32.gmra.mxu1 %vm1154_vm0, %v1149_v53 }
 0x11d   : > { %1634 = vmatprep.mubr.f32.mxu0 %v3880_v17  ;;  %1732 = vmatprep.mubr.f32.mxu1 %v3880_v17 }
 0x1d0   : > { %v1233_v58 = vpop.f32.mrf.mxu0  ;;  %v1334_v61 = vpop.f32.mrf.mxu1 }
 0x1d1   : > { %v1335_v62 = vadd.f32 %v1334_v61, %v1233_v58 }
 0x1d2   : > { %v1235_v63 = vpop.f32.mrf.mxu0  ;;  %v1336_v0 = vpop.f32.mrf.mxu1 }
 0x1d3   : > { %v4247_v2 = vadd.f32 %v1364_v45, %v1335_v62  ;;  %v1337_v3 = vadd.f32 %v1336_v0, %v1235_v63 }
 0x1d4   : > { %v1239_v52 = vpop.f32.mrf.mxu0  ;;  %v1340_v60 = vpop.f32.mrf.mxu1 }
 0x1d5   : > { %v1415_v55 = vand.u32 2147483647, %v4247_v2  ;;  %v4250_v57 = vadd.f32 %v1364_v45, %v1337_v3  ;;  %v1341_v1 = vadd.f32 %v1340_v60, %v1239_v52 }
 0x1d6   : > { %v1241_v4 = vpop.f32.mrf.mxu0  ;;  %v1342_v5 = vpop.f32.mrf.mxu1 }
 0x1d7   : > { %v1423_v7 = vsub.f32 0.0, %v1415_v55  ;;  %v1416_v8 = vand.u32 2147483647, %v4250_v57  ;;  %v4253_v9 = vadd.f32 %v1369_v6, %v1341_v1  ;;  %v1343_v10 = vadd.f32 %v1342_v5, %v1241_v4 }
 0x1d8   : > { %v1245_v36 = vpop.f32.mrf.mxu0  ;;  %v1346_v11 = vpop.f32.mrf.mxu1  ;;  %vm1400_vm15 = vcmp.ne.f32.partialorder %v4250_v57, %v4250_v57 }
 0x1d9   : > { %v1431_v12 = vmul.f32 1.442695, %v1423_v7  ;;  %v1424_v13 = vsub.f32 0.0, %v1416_v8  ;;  %v1347_v14 = vadd.f32 %v1346_v11, %v1245_v36  ;;  %v1417_v15 = vand.u32 2147483647, %v4253_v9 }
 0x1da   : > { %v4256_v16 = vadd.f32 %v1369_v6, %v1343_v10  ;;  %v1247_v18 = vpop.f32.mrf.mxu0  ;;  %v1348_v19 = vpop.f32.mrf.mxu1  ;;  %v1391_v6 = vmax.f32 %v4247_v2, 0.0  ;;  %v1392_v7 = vmax.f32 %v4250_v57, 0.0  ;;  %vm1401_vm14 = vcmp.ne.f32.partialorder %v4253_v9, %v4253_v9 }
 0x1db   : > { %v1433_v20 = vmul.f32 1.442695, %v1424_v13  ;;  %v4258_v56 = vadd.f32 %v1374_v48, %v1347_v14  ;;  %v1349_v21 = vadd.f32 %v1348_v19, %v1247_v18  ;;  %3575 = vpow2.f32 %v1431_v12 }
 0x1dc   : > { %v1425_v37 = vsub.f32 0.0, %v1417_v15  ;;  %v1418_v22 = vand.u32 2147483647, %v4256_v16  ;;  %v1251_v23 = vpop.f32.mrf.mxu0  ;;  %v1352_v24 = vpop.f32.mrf.mxu1  ;;  %v1393_v19 = vmax.f32 %v4253_v9, 0.0  ;;  %vm1402_vm10 = vcmp.ne.f32.partialorder %v4256_v16, %v4256_v16 }
 0x1dd   : > { %3577 = vpow2.f32 %v1433_v20  ;;  %v1419_v25 = vand.u32 2147483647, %v4258_v56  ;;  %v4262_v28 = vadd.f32 %v1374_v48, %v1349_v21  ;;  %v1353_v29 = vadd.f32 %v1352_v24, %v1251_v23 }
 0x1de   : > { %v1435_v26 = vmul.f32 1.442695, %v1425_v37  ;;  %v1426_v27 = vsub.f32 0.0, %v1418_v22  ;;  %v1253_v30 = vpop.f32.mrf.mxu0  ;;  %v1354_v33 = vpop.f32.mrf.mxu1  ;;  %v1394_v20 = vmax.f32 %v4256_v16, 0.0  ;;  %v1395_v37 = vmax.f32 %v4258_v56, 0.0 }
 0x1df   : > { %v1427_v34 = vsub.f32 0.0, %v1419_v25  ;;  %v1355_v35 = vadd.f32 %v1354_v33, %v1253_v30  ;;  %v1420_v32 = vand.u32 2147483647, %v4262_v28  ;;  %v4265_v39 = vadd.f32 %v1379_v54, %v1353_v29 }
 0x1e0   : > { %3579 = vpow2.f32 %v1435_v26  ;;  %v1437_v59 = vmul.f32 1.442695, %v1426_v27  ;;  %v1396_v24 = vmax.f32 %v4262_v28, 0.0  ;;  %vm1404_vm4 = vcmp.ne.f32.partialorder %v4262_v28, %v4262_v28 }
 0x1e1   : > { %v1439_v38 = vmul.f32 1.442695, %v1427_v34  ;;  %v4267_v40 = vadd.f32 %v1379_v54, %v1355_v35  ;;  %v1428_v41 = vsub.f32 0.0, %v1420_v32  ;;  %v1421_v42 = vand.u32 2147483647, %v4265_v39 }
 0x1e2   : > { %3581 = vpow2.f32 %v1437_v59  ;;  %v1397_v25 = vmax.f32 %v4265_v39, 0.0  ;;  %vm1405_vm11 = vcmp.ne.f32.partialorder %v4265_v39, %v4265_v39  ;;  %vm1403_vm12 = vcmp.ne.f32.partialorder %v4258_v56, %v4258_v56 }
 0x1e3   : > { %3583 = vpow2.f32 %v1439_v38  ;;  %v1422_v43 = vand.u32 2147483647, %v4267_v40  ;;  %v1441_v44 = vmul.f32 1.442695, %v1428_v41  ;;  %v1429_v46 = vsub.f32 0.0, %v1421_v42 }
 0x1e4   : > { %v1398_v26 = vmax.f32 %v4267_v40, 0.0  ;;  %vm1406_vm13 = vcmp.ne.f32.partialorder %v4267_v40, %v4267_v40 }
 0x1e5   : > { %v1430_v31 = vsub.f32 0.0, %v1422_v43  ;;  %3585 = vpow2.f32 %v1441_v44  ;;  %v1443_v47 = vmul.f32 1.442695, %v1429_v46 }
 0x1e7   : > { %v1445_v49 = vmul.f32 1.442695, %v1430_v31  ;;  %3587 = vpow2.f32 %v1443_v47 }
 0x1e8   : > { %v3576_v50 = vpop.eup %3575 }
 0x1e9   : > { %3589 = vpow2.f32 %v1445_v49  ;;  %v1447_v54 = vadd.f32 1.0, %v3576_v50  ;;  %v1450_v60 = vmul.f32 -0.5, %v3576_v50  ;;  %v1453_v36 = vand.u32 2147483647, %v3576_v50 }
 0x1ea   : > { %v3578_v51 = vpop.eup %3577 }
 0x1eb   : > { %v1456_v58 = vadd.f32 1.0, %v3578_v51  ;;  %3591 = vlog2.f32 %v1447_v54  ;;  %v1459_v4 = vmul.f32 -0.5, %v3578_v51  ;;  %v1451_v10 = vadd.f32 1.0, %v1450_v60 }
 0x1ec   : > { %v1462_v13 = vand.u32 2147483647, %v3578_v51  ;;  %vm4299_vm1 = vcmp.lt.f32.partialorder %v1453_v36, 0.0004427343 }
 0x1ed   : > { %v3580_v53 = vpop.eup %3579  ;;  %3593 = vlog2.f32 %v1456_v58  ;;  %v1460_v12 = vadd.f32 1.0, %v1459_v4  ;;  %v4297_v29 = vmul.f32 %v3576_v50, %v1451_v10 }
 0x1ee   : > { %v1465_v62 = vadd.f32 1.0, %v3580_v53  ;;  %v1468_v8 = vmul.f32 -0.5, %v3580_v53  ;;  %v1471_v14 = vand.u32 2147483647, %v3580_v53  ;;  %vm4304_vm2 = vcmp.lt.f32.partialorder %v1462_v13, 0.0004427343 }
 0x1ef   : > { %v4271_v61 = vpop.eup %3581  ;;  %v1461_v59 = vmul.f32 %v3578_v51, %v1460_v12 }
 0x1f0   : > { %v4273_v45 = vpop.eup %3583  ;;  %v1474_v48 = vadd.f32 1.0, %v4271_v61  ;;  %v1477_v21 = vmul.f32 -0.5, %v4271_v61  ;;  %v1469_v23 = vadd.f32 1.0, %v1468_v8  ;;  %vm4308_vm3 = vcmp.lt.f32.partialorder %v1471_v14, 0.0004427343 }
 0x1f1   : > { %v1483_v63 = vadd.f32 1.0, %v4273_v45  ;;  %v1486_v11 = vmul.f32 -0.5, %v4273_v45  ;;  %v1489_v44 = vand.u32 2147483647, %v4273_v45  ;;  %v1480_v49 = vand.u32 2147483647, %v4271_v61 }
 0x1f2   : > { %v4277_v0 = vpop.eup %3585  ;;  %v1478_v43 = vadd.f32 1.0, %v1477_v21  ;;  %v1470_v47 = vmul.f32 %v3580_v53, %v1469_v23 }
 0x1f3   : > { %3595 = vlog2.f32 %v1483_v63  ;;  %v1492_v3 = vadd.f32 1.0, %v4277_v0  ;;  %v1495_v15 = vmul.f32 -0.5, %v4277_v0  ;;  %v1487_v33 = vadd.f32 1.0, %v1486_v11 }
 0x1f4   : > { %3597 = vlog2.f32 %v1474_v48  ;;  %v4280_v52 = vpop.eup %3587  ;;  %v1498_v46 = vand.u32 2147483647, %v4277_v0  ;;  %vm4322_vm5 = vcmp.lt.f32.partialorder %v1489_v44, 0.0004427343  ;;  %vm4326_vm7 = vcmp.lt.f32.partialorder %v1480_v49, 0.0004427343 }
 0x1f5   : > { %3599 = vlog2.f32 %v1465_v62  ;;  %v1501_v55 = vadd.f32 1.0, %v4280_v52  ;;  %v1504_v34 = vmul.f32 -0.5, %v4280_v52  ;;  %v1496_v41 = vadd.f32 1.0, %v1495_v15 }
 0x1f6   : > { %3601 = vlog2.f32 %v1492_v3  ;;  %v4283_v1 = vpop.eup %3589  ;;  %v1507_v51 = vand.u32 2147483647, %v4280_v52  ;;  %v1488_v62 = vmul.f32 %v4273_v45, %v1487_v33  ;;  %vm1499_vm6 = vcmp.lt.f32.partialorder %v1498_v46, 0.0004427343 }
 0x1f7   : > { %3603 = vlog2.f32 %v1501_v55  ;;  %v1510_v5 = vadd.f32 1.0, %v4283_v1  ;;  %v1513_v31 = vmul.f32 -0.5, %v4283_v1  ;;  %v1505_v63 = vadd.f32 1.0, %v1504_v34 }
 0x1f8   : > { %v3592_v18 = vpop.eup %3591  ;;  %v1497_v4 = vmul.f32 %v4277_v0, %v1496_v41  ;;  %v1516_v12 = vand.u32 2147483647, %v4283_v1  ;;  %vm1508_vm8 = vcmp.lt.f32.partialorder %v1507_v51, 0.0004427343 }
 0x1f9   : > { %3605 = vlog2.f32 %v1510_v5  ;;  %v1449_v58 = vmul.f32 0.6931472, %v3592_v18  ;;  %v1479_v5 = vmul.f32 %v4271_v61, %v1478_v43  ;;  %v1514_v8 = vadd.f32 1.0, %v1513_v31 }
 0x1fa   : > { %v3594_v22 = vpop.eup %3593  ;;  %v1506_v14 = vmul.f32 %v4280_v52, %v1505_v63  ;;  %vm1517_vm9 = vcmp.lt.f32.partialorder %v1516_v12, 0.0004427343  ;;  %v706_v63 = vld [vmem:[%s4399_s23] sm:$0xff] }
 0x1fb   : > { %v1458_v3 = vmul.f32 0.6931472, %v3594_v22  ;;  %v1455_v18 = vsel %vm4299_vm1, %v4297_v29, %v1449_v58  ;;  %vm1399_vm1 = vcmp.ne.f32.partialorder %v4247_v2, %v4247_v2 }
 0x1fd   : > { %v1464_v21 = vsel %vm4304_vm2, %v1461_v59, %v1458_v3  ;;  %vm1563_vm2 = vcmask 261120   ;;  %v1647_v3 = vld [vmem:[%s5207_s8] sm:$0xff] }
 0x200   : > { %v3596_v27 = vpop.eup %3595 }
 0x201   : > { %v3598_v35 = vpop.eup %3597  ;;  %v1485_v50 = vmul.f32 0.6931472, %v3596_v27 }
 0x202   : > { %v3600_v42 = vpop.eup %3599  ;;  %v1476_v48 = vmul.f32 0.6931472, %v3598_v35 }
 0x203   : > { %v3602_v54 = vpop.eup %3601  ;;  %v1467_v60 = vmul.f32 0.6931472, %v3600_v42  ;;  %v1491_v45 = vsel %vm4322_vm5, %v1488_v62, %v1485_v50  ;;  %v707_v62 = vld [vmem:[%s4399_s23 + $0x8] sm:$0xff] }
 0x204   : > { %v1494_v55 = vmul.f32 0.6931472, %v3602_v54  ;;  %v3604_v10 = vpop.eup %3603  ;;  %v1482_v61 = vsel %vm4326_vm7, %v1479_v5, %v1476_v48  ;;  %v1523_v23 = vadd.f32 %v1491_v45, %v1395_v37 }
 0x205   : > { %v1503_v13 = vmul.f32 0.6931472, %v3604_v10  ;;  %v1473_v22 = vsel %vm4308_vm3, %v1470_v47, %v1467_v60  ;;  %v1522_v34 = vadd.f32 %v1482_v61, %v1394_v20  ;;  %vm1757_vm3 = vcmask 195584   ;;  %v1648_v60 = vld [vmem:[%s5207_s8 + $0x8] sm:$0xff]  ;;  %v1561_v10 = vpop.permute.xlu1 %1560 }
 0x206   : > { %v1500_v11 = vsel %vm1499_vm6, %v1497_v4, %v1494_v55  ;;  %v3606_v15 = vpop.eup %3605  ;;  %v1521_v29 = vadd.f32 %v1473_v22, %v1393_v19  ;;  %v1519_v19 = vadd.f32 %v1455_v18, %v1391_v6  ;;  %v1531_v35 = vsel %vm1403_vm12, %v4258_v56, %v1523_v23  ;;  %v1649_v55 = vld [vmem:[%s5207_s8 + $0x10] sm:$0xff]  ;;  %v1650_v4 = vld [vmem:[%s5207_s8 + $0x18] sm:$0xff] }
 0x207   : > { %v1524_v0 = vadd.f32 %v1500_v11, %v1396_v24  ;;  %v1509_v27 = vsel %vm1508_vm8, %v1506_v14, %v1503_v13  ;;  %v1512_v33 = vmul.f32 0.6931472, %v3606_v15  ;;  %v1515_v24 = vmul.f32 %v4283_v1, %v1514_v8  ;;  %v1556_v11 = vpop.permute.xlu0 %1555  ;;  %v1651_v13 = vld [vmem:[%s5208_s9] sm:$0xff]  ;;  %v1652_v14 = vld [vmem:[%s5208_s9 + $0x8] sm:$0xff]  ;;  %v1653_v15 = vld [vmem:[%s5208_s9 + $0x10] sm:$0xff] }
 0x208   : > { %v1525_v30 = vadd.f32 %v1509_v27, %v1397_v25  ;;  %v1520_v1 = vadd.f32 %v1464_v21, %v1392_v7  ;;  %v1530_v7 = vsel %vm1402_vm10, %v4256_v16, %v1522_v34  ;;  %v1527_v38 = vsel %vm1399_vm1, %v4247_v2, %v1519_v19  ;;  %v1654_v18 = vld [vmem:[%s5208_s9 + $0x18] sm:$0xff] }
 0x209   : > { %v1532_v52 = vsel %vm1404_vm4, %v4262_v28, %v1524_v0  ;;  %v1518_v37 = vsel %vm1517_vm9, %v1515_v24, %v1512_v33  ;;  %vm1655_vm4 = vcmask 130048  }
 0x20a   : > { %v1533_v20 = vsel %vm1405_vm11, %v4265_v39, %v1525_v30  ;;  %v1526_v25 = vadd.f32 %v1518_v37, %v1398_v26  ;;  %3607 = vtanh.f32 %v1532_v52  ;;  %v1529_v26 = vsel %vm1401_vm14, %v4253_v9, %v1521_v29  ;;  %v1881_v52 = vpop.permute.xlu1 %1880 }
 0x20b   : > { %3609 = vtanh.f32 %v1533_v20  ;;  %v1528_v6 = vsel %vm1400_vm15, %v4250_v57, %v1520_v1  ;;  %v1876_v27 = vpop.permute.xlu0 %1875 }
 0x20c   : > { %v1534_v59 = vsel %vm1406_vm13, %v4267_v40, %v1526_v25 }
 0x20d   : > { %3611 = vtanh.f32 %v1534_v59 }
 0x20e   : > { %3613 = vtanh.f32 %v1531_v35 }
 0x20f   : > { %3615 = vtanh.f32 %v1530_v7  ;;  %v1866_v34 = vpop.permute.xlu0 %1865 }
 0x210   : > { %3617 = vtanh.f32 %v1529_v26 }
 0x211   : > { %3619 = vtanh.f32 %v1528_v6  ;;  %v1871_v6 = vpop.permute.xlu1 %1870 }
 0x212   : > { %3621 = vtanh.f32 %v1527_v38 }
 0x217   : > { %v3608_v32 = vpop.eup %3607 }
 0x218   : > { %v3610_v41 = vpop.eup %3609  ;;  %v1548_v49 = vmul.f32 %v3608_v32, %v4262_v28  ;;  %v1389_v28 = vld [vmem:[%s5266_s6] sm:$0xff] }
 0x219   : > { %v1549_v31 = vmul.f32 %v3610_v41, %v4265_v39 }
 0x21a   : > { %v3612_v42 = vpop.eup %3611 }
 0x21b   : > { %v3614_v43 = vpop.eup %3613  ;;  %v1550_v44 = vmul.f32 %v3612_v42, %v4267_v40 }
 0x21c   : > { %v3616_v46 = vpop.eup %3615  ;;  %v1547_v51 = vmul.f32 %v3614_v43, %v4258_v56  ;;  %v708_v56 = vld [vmem:[%s4399_s23 + $0x10] sm:$0xff] }
 0x21d   : > { %v3618_v47 = vpop.eup %3617  ;;  %1594 = vmatprep.subr.mxu0 %v1550_v44  ;;  %v1546_v58 = vmul.f32 %v3616_v46, %v4256_v16  ;;  %v709_v16 = vld [vmem:[%s4399_s23 + $0x18] sm:$0xff] }
 0x21e   : > { %v3620_v50 = vpop.eup %3619  ;;  %1595 = vmatpush1.msra.mxu0 %v1549_v31  ;;  %v1545_v48 = vmul.f32 %v3618_v47, %v4253_v9  ;;  %v1390_v9 = vld [vmem:[%s5266_s6 + $0x8] sm:$0xff] }
 0x21f   : > { %v3622_v54 = vpop.eup %3621  ;;  %1596 = vmatprep.subr.mxu0 %v1548_v49  ;;  %v1544_v40 = vmul.f32 %v3620_v50, %v4250_v57  ;;  %v710_v57 = vld [vmem:[%s4399_s23 + $0x20] sm:$0xff] }
 0x220   : > { %1597 = vmatpush1.msra.mxu0 %v1547_v51  ;;  %v1543_v39 = vmul.f32 %v3622_v54, %v4247_v2  ;;  %v711_v2 = vld [vmem:[%s4399_s23 + $0x28] sm:$0xff] }
 0x221   : > { %1598 = vmatprep.subr.mxu0 %v1546_v58 }
 0x222   : > { %1599 = vmatpush1.msra.mxu0 %v1545_v48 }
 0x223   : > { %1600 = vmatprep.subr.mxu0 %v1544_v40 }
 0x224   : > { %1601 = vmatpush1.msra.mxu0 %v1543_v39 }
 0x225   : > { %3469 = vmatmul.mubr.msk.f32.vlgmr.msra.gmra.mxu0 %vm1563_vm2, %v1389_v28  ;;  %1796 = vmatprep.subr.mxu0 %v711_v2 }
 0x226   : > { %1640 = vmatprep.mubr.f32.mxu0 %v3880_v17  ;;  %1797 = vmatpush1.msra.mxu0 %v710_v57 }
 0x227   : > { %1798 = vmatprep.subr.mxu0 %v709_v16 }
 0x228   : > { %1799 = vmatpush1.msra.mxu0 %v708_v56 }
 0x229   : > { %3470 = vmatmul.mubr.msk.f32.gmra.mxu0 %vm1563_vm2, %v1390_v9  ;;  %1800 = vmatprep.subr.mxu0 %v707_v62 }
 0x22a   : > { %1834 = vmatprep.mubr.f32.mxu0 %v3880_v17  ;;  %1801 = vmatpush1.msra.mxu0 %v706_v63 }
 0x22d   : > { %3475 = vmatmul.mubr.msk.f32.vlgmr.msra.gmra.mxu0 %vm1757_vm3, %v1647_v3 }
 0x22e   : > { %1840 = vmatprep.mubr.f32.mxu0 %v3880_v17 }
 0x231   : > { %3476 = vmatmul.mubr.msk.f32.gmra.mxu0 %vm1757_vm3, %v1648_v60 }
 0x232   : > { %1846 = vmatprep.mubr.f32.mxu0 %v3880_v17 }
 0x235   : > { %3477 = vmatmul.mubr.msk.f32.gmra.mxu0 %vm1757_vm3, %v1649_v55 }
 0x236   : > { %1852 = vmatprep.mubr.f32.mxu0 %v3880_v17 }
 0x239   : > { %3478 = vmatmul.mubr.msk.f32.gmra.mxu0 %vm1757_vm3, %v1650_v4 }
 0x23a   : > { %2588 = vmatprep.mubr.f32.mxu0 %v3880_v17 }
 0x2e5   : > { %v1636_v5 = vpop.f32.mrf.mxu0 }
 0x2e6   : > { %v1637_v0 = vadd.f32 %v1636_v5, %v1556_v11 }
 0x2e7   : > { %v1638_v53 = vpop.f32.mrf.mxu0 }
 0x2e8   : > { %v1639_v61 = vadd.f32 %v1638_v53, %v1556_v11 }
 0x2e9   : > { %v1642_v8 = vpop.f32.mrf.mxu0 }
 0x2ea   : > { %v1643_v12 = vadd.f32 %v1642_v8, %v1561_v10 }
 0x2eb   : > { %v1644_v36 = vpop.f32.mrf.mxu0 }
 0x2ec   : > { %v1645_v45 = vadd.f32 %v1644_v36, %v1561_v10 }
 0x2ed   : > { %v1836_v21 = vpop.f32.mrf.mxu0 }
 0x2ee   : > { %1696 = vmatprep.subr.mxu1 %v1645_v45 }
 0x2ef   : > { %1697 = vmatpush1.msra.mxu1 %v1643_v12  ;;  %v1838_v22 = vpop.f32.mrf.mxu0 }
 0x2f0   : > { %1698 = vmatprep.subr.mxu1 %v1639_v61 }
 0x2f1   : > { %1699 = vmatpush1.msra.mxu1 %v1637_v0  ;;  %v1842_v23 = vpop.f32.mrf.mxu0 }
 0x2f2   : > { %3471 = vmatmul.mubr.msk.f32.vlgmr.msra.gmra.mxu1 %vm1655_vm4, %v1651_v13 }
 0x2f3   : > { %1738 = vmatprep.mubr.f32.mxu1 %v3880_v17  ;;  %v1844_v33 = vpop.f32.mrf.mxu0 }
 0x2f5   : > { %v1848_v37 = vpop.f32.mrf.mxu0 }
 0x2f6   : > { %3472 = vmatmul.mubr.msk.f32.gmra.mxu1 %vm1655_vm4, %v1652_v14 }
 0x2f7   : > { %1744 = vmatprep.mubr.f32.mxu1 %v3880_v17  ;;  %v1850_v26 = vpop.f32.mrf.mxu0 }
 0x2f9   : > { %v1854_v51 = vpop.f32.mrf.mxu0 }
 0x2fa   : > { %3473 = vmatmul.mubr.msk.f32.gmra.mxu1 %vm1655_vm4, %v1653_v15 }
 0x2fb   : > { %1750 = vmatprep.mubr.f32.mxu1 %v3880_v17  ;;  %v1856_v63 = vpop.f32.mrf.mxu0 }
 0x2fe   : > { %3474 = vmatmul.mubr.msk.f32.gmra.mxu1 %vm1655_vm4, %v1654_v18 }
 0x2ff   : > { %2227 = vmatprep.mubr.f32.mxu1 %v3880_v17 }
 0x3b2   : > { %v1734_v24 = vpop.f32.mrf.mxu1 }
 0x3b3   : > { %v1837_v30 = vadd.f32 %v1836_v21, %v1734_v24 }
 0x3b4   : > { %v1736_v29 = vpop.f32.mrf.mxu1 }
 0x3b5   : > { %v4439_v1 = vadd.f32 %v1866_v34, %v1837_v30  ;;  %v1839_v20 = vadd.f32 %v1838_v22, %v1736_v29 }
 0x3b6   : > { %v1740_v25 = vpop.f32.mrf.mxu1 }
 0x3b7   : > { %v1915_v19 = vand.u32 2147483647, %v4439_v1  ;;  %v4442_v35 = vadd.f32 %v1866_v34, %v1839_v20  ;;  %v1843_v7 = vadd.f32 %v1842_v23, %v1740_v25  ;;  %v1891_v30 = vmax.f32 %v4439_v1, 0.0 }
 0x3b8   : > { %v1742_v59 = vpop.f32.mrf.mxu1  ;;  %vm1899_vm5 = vcmp.ne.f32.partialorder %v4439_v1, %v4439_v1 }
 0x3b9   : > { %v1923_v38 = vsub.f32 0.0, %v1915_v19  ;;  %v1916_v32 = vand.u32 2147483647, %v4442_v35  ;;  %v4445_v41 = vadd.f32 %v1871_v6, %v1843_v7  ;;  %v1845_v42 = vadd.f32 %v1844_v33, %v1742_v59 }
 0x3ba   : > { %v1746_v43 = vpop.f32.mrf.mxu1  ;;  %v1892_v29 = vmax.f32 %v4442_v35, 0.0  ;;  %vm1900_vm7 = vcmp.ne.f32.partialorder %v4442_v35, %v4442_v35 }
 0x3bb   : > { %v1931_v44 = vmul.f32 1.442695, %v1923_v38  ;;  %v1924_v46 = vsub.f32 0.0, %v1916_v32  ;;  %v1849_v31 = vadd.f32 %v1848_v37, %v1746_v43  ;;  %v1917_v47 = vand.u32 2147483647, %v4445_v41 }
 0x3bc   : > { %v4448_v49 = vadd.f32 %v1871_v6, %v1845_v42  ;;  %v1748_v50 = vpop.f32.mrf.mxu1  ;;  %vm1901_vm9 = vcmp.ne.f32.partialorder %v4445_v41, %v4445_v41 }
 0x3bd   : > { %3623 = vpow2.f32 %v1931_v44  ;;  %v1933_v54 = vmul.f32 1.442695, %v1924_v46  ;;  %v4450_v58 = vadd.f32 %v1876_v27, %v1849_v31  ;;  %v1851_v48 = vadd.f32 %v1850_v26, %v1748_v50 }
 0x3be   : > { %v1925_v40 = vsub.f32 0.0, %v1917_v47  ;;  %v1918_v39 = vand.u32 2147483647, %v4448_v49  ;;  %v1752_v28 = vpop.f32.mrf.mxu1  ;;  %v1893_v26 = vmax.f32 %v4445_v41, 0.0  ;;  %v1894_v6 = vmax.f32 %v4448_v49, 0.0 }
 0x3bf   : > { %3625 = vpow2.f32 %v1933_v54  ;;  %v1919_v9 = vand.u32 2147483647, %v4450_v58  ;;  %v4454_v16 = vadd.f32 %v1876_v27, %v1851_v48  ;;  %v1855_v56 = vadd.f32 %v1854_v51, %v1752_v28 }
 0x3c0   : > { %v1935_v2 = vmul.f32 1.442695, %v1925_v40  ;;  %v1926_v57 = vsub.f32 0.0, %v1918_v39  ;;  %v1754_v62 = vpop.f32.mrf.mxu1  ;;  %v1895_v38 = vmax.f32 %v4450_v58, 0.0  ;;  %vm1902_vm11 = vcmp.ne.f32.partialorder %v4448_v49, %v4448_v49 }
 0x3c1   : > { %v1927_v3 = vsub.f32 0.0, %v1919_v9  ;;  %v1857_v60 = vadd.f32 %v1856_v63, %v1754_v62  ;;  %v1920_v5 = vand.u32 2147483647, %v4454_v16  ;;  %v4457_v53 = vadd.f32 %v1881_v52, %v1855_v56 }
 0x3c2   : > { %3627 = vpow2.f32 %v1935_v2  ;;  %v1937_v55 = vmul.f32 1.442695, %v1926_v57  ;;  %v1896_v43 = vmax.f32 %v4454_v16, 0.0  ;;  %vm1903_vm14 = vcmp.ne.f32.partialorder %v4450_v58, %v4450_v58 }
 0x3c3   : > { %v1939_v4 = vmul.f32 1.442695, %v1927_v3  ;;  %v4459_v8 = vadd.f32 %v1881_v52, %v1857_v60  ;;  %v1928_v10 = vsub.f32 0.0, %v1920_v5  ;;  %v1921_v36 = vand.u32 2147483647, %v4457_v53 }
 0x3c4   : > { %3629 = vpow2.f32 %v1937_v55  ;;  %v1897_v47 = vmax.f32 %v4457_v53, 0.0  ;;  %vm1904_vm1 = vcmp.ne.f32.partialorder %v4454_v16, %v4454_v16 }
 0x3c5   : > { %3631 = vpow2.f32 %v1939_v4  ;;  %v1922_v45 = vand.u32 2147483647, %v4459_v8  ;;  %v1941_v11 = vmul.f32 1.442695, %v1928_v10  ;;  %v1929_v12 = vsub.f32 0.0, %v1921_v36 }
 0x3c6   : > { %v1898_v50 = vmax.f32 %v4459_v8, 0.0 }
 0x3c7   : > { %v1930_v61 = vsub.f32 0.0, %v1922_v45  ;;  %3633 = vpow2.f32 %v1941_v11  ;;  %v1943_v13 = vmul.f32 1.442695, %v1929_v12 }
 0x3c9   : > { %v1945_v14 = vmul.f32 1.442695, %v1930_v61  ;;  %3635 = vpow2.f32 %v1943_v13 }
 0x3ca   : > { %v3624_v0 = vpop.eup %3623 }
 0x3cb   : > { %v1947_v15 = vadd.f32 1.0, %v3624_v0  ;;  %v1950_v24 = vmul.f32 -0.5, %v3624_v0  ;;  %v1953_v20 = vand.u32 2147483647, %v3624_v0 }
 0x3cc   : > { %v3626_v18 = vpop.eup %3625 }
 0x3cd   : > { %3637 = vlog2.f32 %v1947_v15  ;;  %v1956_v21 = vadd.f32 1.0, %v3626_v18  ;;  %v1959_v37 = vmul.f32 -0.5, %v3626_v18  ;;  %v1962_v25 = vand.u32 2147483647, %v3626_v18 }
 0x3ce   : > { %3639 = vpow2.f32 %v1945_v14  ;;  %v1951_v59 = vadd.f32 1.0, %v1950_v24  ;;  %vm4478_vm6 = vcmp.lt.f32.partialorder %v1953_v20, 0.0004427343 }
 0x3cf   : > { %v3628_v22 = vpop.eup %3627  ;;  %3641 = vlog2.f32 %v1956_v21  ;;  %v1960_v46 = vadd.f32 1.0, %v1959_v37  ;;  %vm4484_vm8 = vcmp.lt.f32.partialorder %v1962_v25, 0.0004427343 }
 0x3d0   : > { %v1965_v23 = vadd.f32 1.0, %v3628_v22  ;;  %v1968_v19 = vmul.f32 -0.5, %v3628_v22  ;;  %v1971_v31 = vand.u32 2147483647, %v3628_v22  ;;  %v1952_v28 = vmul.f32 %v3624_v0, %v1951_v59 }
 0x3d1   : > { %v3630_v27 = vpop.eup %3629  ;;  %v1961_v4 = vmul.f32 %v3626_v18, %v1960_v46 }
 0x3d2   : > { %v3632_v33 = vpop.eup %3631  ;;  %3643 = vlog2.f32 %v1965_v23  ;;  %v1974_v34 = vadd.f32 1.0, %v3630_v27  ;;  %v1977_v32 = vmul.f32 -0.5, %v3630_v27  ;;  %v1969_v40 = vadd.f32 1.0, %v1968_v19 }
 0x3d3   : > { %v1983_v52 = vadd.f32 1.0, %v3632_v33  ;;  %v1986_v42 = vmul.f32 -0.5, %v3632_v33  ;;  %v1980_v9 = vand.u32 2147483647, %v3630_v27  ;;  %v1989_v2 = vand.u32 2147483647, %v3632_v33 }
 0x3d4   : > { %3645 = vlog2.f32 %v1974_v34  ;;  %v4465_v7 = vpop.eup %3633  ;;  %v1978_v63 = vadd.f32 1.0, %v1977_v32  ;;  %vm4494_vm10 = vcmp.lt.f32.partialorder %v1971_v31, 0.0004427343  ;;  %v1970_v11 = vmul.f32 %v3628_v22, %v1969_v40 }
 0x3d5   : > { %3647 = vlog2.f32 %v1983_v52  ;;  %v1992_v44 = vadd.f32 1.0, %v4465_v7  ;;  %v1987_v3 = vadd.f32 1.0, %v1986_v42  ;;  %v1995_v60 = vmul.f32 -0.5, %v4465_v7 }
 0x3d6   : > { %v4476_v51 = vpop.eup %3635  ;;  %v1998_v12 = vand.u32 2147483647, %v4465_v7  ;;  %vm4504_vm12 = vcmp.lt.f32.partialorder %v1980_v9, 0.0004427343  ;;  %vm4508_vm13 = vcmp.lt.f32.partialorder %v1989_v2, 0.0004427343  ;;  %v1979_v18 = vmul.f32 %v3630_v27, %v1978_v63 }
 0x3d7   : > { %3649 = vlog2.f32 %v1992_v44  ;;  %v2001_v57 = vadd.f32 1.0, %v4476_v51  ;;  %v1988_v21 = vmul.f32 %v3632_v33, %v1987_v3  ;;  %v1996_v22 = vadd.f32 1.0, %v1995_v60 }
 0x3d8   : > { %v2004_v52 = vmul.f32 -0.5, %v4476_v51  ;;  %vm4521_vm15 = vcmp.lt.f32.partialorder %v1998_v12, 0.0004427343  ;;  %v2007_v27 = vand.u32 2147483647, %v4476_v51 }
 0x3d9   : > { %3651 = vlog2.f32 %v2001_v57  ;;  %v1997_v31 = vmul.f32 %v4465_v7, %v1996_v22 }
 0x3da   : > { %v3638_v39 = vpop.eup %3637  ;;  %v2005_v54 = vadd.f32 1.0, %v2004_v52  ;;  %vm2008_vm3 = vcmp.lt.f32.partialorder %v2007_v27, 0.0004427343 }
 0x3db   : > { %v4489_v56 = vpop.eup %3639  ;;  %v1949_v62 = vmul.f32 0.6931472, %v3638_v39 }
 0x3dc   : > { %v3642_v55 = vpop.eup %3641  ;;  %v2010_v10 = vadd.f32 1.0, %v4489_v56  ;;  %v2013_v59 = vmul.f32 -0.5, %v4489_v56  ;;  %v2006_v5 = vmul.f32 %v4476_v51, %v2005_v54 }
 0x3dd   : > { %v1955_v36 = vsel %vm4478_vm6, %v1952_v28, %v1949_v62  ;;  %v1958_v45 = vmul.f32 0.6931472, %v3642_v55  ;;  %vm1906_vm6 = vcmp.ne.f32.partialorder %v4459_v8, %v4459_v8 }
 0x3de   : > { %v2019_v61 = vadd.f32 %v1955_v36, %v1891_v30  ;;  %3653 = vlog2.f32 %v2010_v10  ;;  %v2014_v63 = vadd.f32 1.0, %v2013_v59 }
 0x3df   : > { %v3644_v14 = vpop.eup %3643  ;;  %v1964_v15 = vsel %vm4484_vm8, %v1961_v4, %v1958_v45 }
 0x3e0   : > { %v2027_v23 = vsel %vm1899_vm5, %v4439_v1, %v2019_v61  ;;  %v2020_v24 = vadd.f32 %v1964_v15, %v1892_v29  ;;  %v1967_v34 = vmul.f32 0.6931472, %v3644_v14  ;;  %v2015_v61 = vmul.f32 %v4489_v56, %v2014_v63 }
 0x3e1   : > { %v3646_v30 = vpop.eup %3645  ;;  %3655 = vtanh.f32 %v2027_v23  ;;  %v2043_v20 = vsub.f32 0.0, %v2027_v23  ;;  %vm1905_vm5 = vcmp.ne.f32.partialorder %v4457_v53, %v4457_v53 }
 0x3e2   : > { %v3648_v33 = vpop.eup %3647  ;;  %v2028_v25 = vsel %vm1900_vm7, %v4442_v35, %v2020_v24  ;;  %v1973_v29 = vsel %vm4494_vm10, %v1970_v11, %v1967_v34  ;;  %v1976_v19 = vmul.f32 0.6931472, %v3646_v30 }
 0x3e3   : > { %3657 = vtanh.f32 %v2028_v25  ;;  %v2021_v32 = vadd.f32 %v1973_v29, %v1893_v26  ;;  %v1985_v42 = vmul.f32 0.6931472, %v3648_v33  ;;  %v2051_v44 = vmul.f32 1.442695, %v2043_v20 }
 0x3e4   : > { %v1982_v46 = vsel %vm4504_vm12, %v1979_v18, %v1976_v19  ;;  %v2044_v48 = vsub.f32 0.0, %v2028_v25  ;;  %v3650_v28 = vpop.eup %3649 }
 0x3e5   : > { %v2029_v40 = vsel %vm1901_vm9, %v4445_v41, %v2021_v32  ;;  %v2022_v26 = vadd.f32 %v1982_v46, %v1894_v6  ;;  %v1991_v39 = vsel %vm4508_vm13, %v1988_v21, %v1985_v42  ;;  %3659 = vpow2.f32 %v2051_v44 }
 0x3e6   : > { %3661 = vtanh.f32 %v2029_v40  ;;  %v2023_v9 = vadd.f32 %v1991_v39, %v1895_v38  ;;  %v2053_v7 = vmul.f32 1.442695, %v2044_v48  ;;  %v2045_v2 = vsub.f32 0.0, %v2029_v40  ;;  %v3652_v38 = vpop.eup %3651 }
 0x3e7   : > { %v2030_v57 = vsel %vm1902_vm11, %v4448_v49, %v2022_v26  ;;  %v1994_v62 = vmul.f32 0.6931472, %v3650_v28  ;;  %v2016_v6 = vand.u32 2147483647, %v4489_v56  ;;  %v2003_v45 = vmul.f32 0.6931472, %v3652_v38 }
 0x3e8   : > { %3663 = vtanh.f32 %v2030_v57  ;;  %v2031_v3 = vsel %vm1903_vm14, %v4450_v58, %v2023_v9  ;;  %v2055_v60 = vmul.f32 1.442695, %v2045_v2  ;;  %v2046_v55 = vsub.f32 0.0, %v2030_v57 }
 0x3e9   : > { %3665 = vtanh.f32 %v2031_v3  ;;  %v2000_v4 = vsel %vm4521_vm15, %v1997_v31, %v1994_v62  ;;  %v2047_v10 = vsub.f32 0.0, %v2031_v3  ;;  %v2009_v14 = vsel %vm2008_vm3, %v2006_v5, %v2003_v45 }
 0x3ea   : > { %v2024_v36 = vadd.f32 %v2000_v4, %v1896_v43  ;;  %3667 = vpow2.f32 %v2053_v7  ;;  %v2057_v11 = vmul.f32 1.442695, %v2046_v55  ;;  %v2025_v43 = vadd.f32 %v2009_v14, %v1897_v47 }
 0x3eb   : > { %v3654_v12 = vpop.eup %3653  ;;  %3669 = vpow2.f32 %v2055_v60  ;;  %v2059_v0 = vmul.f32 1.442695, %v2047_v10  ;;  %vm2017_vm4 = vcmp.lt.f32.partialorder %v2016_v6, 0.0004427343 }
 0x3ec   : > { %v2032_v13 = vsel %vm1904_vm1, %v4454_v16, %v2024_v36  ;;  %v2012_v51 = vmul.f32 0.6931472, %v3654_v12  ;;  %3671 = vpow2.f32 %v2057_v11  ;;  %v2033_v21 = vsel %vm1905_vm5, %v4457_v53, %v2025_v43 }
 0x3ed   : > { %3673 = vtanh.f32 %v2032_v13  ;;  %v2048_v15 = vsub.f32 0.0, %v2032_v13  ;;  %v2049_v34 = vsub.f32 0.0, %v2033_v21 }
 0x3ee   : > { %v4571_v18 = vpop.eup %3655  ;;  %v2018_v56 = vsel %vm2017_vm4, %v2015_v61, %v2012_v51  ;;  %3675 = vpow2.f32 %v2059_v0 }
 0x3ef   : > { %v2026_v22 = vadd.f32 %v2018_v56, %v1898_v50  ;;  %v2083_v23 = vmul.f32 %v4571_v18, %v4571_v18  ;;  %3677 = vtanh.f32 %v2033_v21  ;;  %v2061_v47 = vmul.f32 1.442695, %v2048_v15 }
 0x3f0   : > { %v4580_v24 = vpop.eup %3657  ;;  %v2063_v50 = vmul.f32 1.442695, %v2049_v34 }
 0x3f1   : > { %v2034_v52 = vsel %vm1906_vm6, %v4459_v8, %v2026_v22  ;;  %v2091_v30 = vsub.f32 1.0, %v2083_v23  ;;  %v2084_v37 = vmul.f32 %v4580_v24, %v4580_v24 }
 0x3f2   : > { %v3660_v27 = vpop.eup %3659  ;;  %3679 = vtanh.f32 %v2034_v52  ;;  %v2050_v20 = vsub.f32 0.0, %v2034_v52 }
 0x3f3   : > { %v4587_v33 = vpop.eup %3661  ;;  %v2067_v25 = vsub.f32 1.0, %v3660_v27  ;;  %v2099_v29 = vmul.f32 %v2091_v30, %v4439_v1  ;;  %v2092_v19 = vsub.f32 1.0, %v2084_v37  ;;  %3681 = vpow2.f32 %v2061_v47 }
 0x3f4   : > { %v2085_v59 = vmul.f32 %v4587_v33, %v4587_v33  ;;  %3683 = vpow2.f32 %v2063_v50  ;;  %v2065_v32 = vmul.f32 1.442695, %v2050_v20 }
 0x3f5   : > { %v3664_v42 = vpop.eup %3663  ;;  %v2107_v44 = vmul.f32 %v2099_v29, %v2067_v25  ;;  %v2100_v46 = vmul.f32 %v2092_v19, %v4442_v35 }
 0x3f6   : > { %v3666_v31 = vpop.eup %3665  ;;  %v2093_v54 = vsub.f32 1.0, %v2085_v59  ;;  %v2086_v48 = vmul.f32 %v3664_v42, %v3664_v42  ;;  %3685 = vpow2.f32 %v2065_v32  ;;  %v2078_v59 = vmul.f32 %v3664_v42, %v4448_v49 }
 0x3f7   : > { %v3668_v40 = vpop.eup %3667  ;;  %v4594_v26 = vadd.f32 %v4571_v18, %v2107_v44  ;;  %v2087_v39 = vmul.f32 %v3666_v31, %v3666_v31  ;;  %v2079_v29 = vmul.f32 %v3666_v31, %v4450_v58 }
 0x3f8   : > { %v3670_v28 = vpop.eup %3669  ;;  %v2068_v9 = vsub.f32 1.0, %v3668_v40  ;;  %v2101_v7 = vmul.f32 %v2093_v54, %v4445_v41  ;;  %v2094_v2 = vsub.f32 1.0, %v2086_v48 }
 0x3f9   : > { %v3672_v57 = vpop.eup %3671  ;;  %v2069_v62 = vsub.f32 1.0, %v3670_v28  ;;  %v2095_v63 = vsub.f32 1.0, %v2087_v39 }
 0x3fa   : > { %v3674_v6 = vpop.eup %3673  ;;  %v2108_v3 = vmul.f32 %v2100_v46, %v2068_v9  ;;  %v2070_v60 = vsub.f32 1.0, %v3672_v57  ;;  %v2102_v55 = vmul.f32 %v2094_v2, %v4448_v49  ;;  %v2075_v49 = vmul.f32 %v4571_v18, %v4439_v1  ;;  %v2125_v1 = vld [vmem:[%s5210_s11 + $0x10] sm:$0xff]  ;;  %v2144_v18 = vpop.permute.xlu0 %2143 }
 0x3fb   : > { %v3676_v38 = vpop.eup %3675  ;;  %v2109_v4 = vmul.f32 %v2101_v7, %v2069_v62  ;;  %v2103_v5 = vmul.f32 %v2095_v63, %v4450_v58  ;;  %v2088_v10 = vmul.f32 %v3674_v6, %v3674_v6  ;;  %v2080_v37 = vmul.f32 %v3674_v6, %v4454_v16 }
 0x3fc   : > { %v4600_v36 = vadd.f32 %v4580_v24, %v2108_v3  ;;  %v2110_v45 = vmul.f32 %v2102_v55, %v2070_v60  ;;  %v2071_v11 = vsub.f32 1.0, %v3676_v38  ;;  %v3678_v12 = vpop.eup %3677 }
 0x3fd   : > { %v4603_v61 = vadd.f32 %v4587_v33, %v2109_v4  ;;  %v2096_v0 = vsub.f32 1.0, %v2088_v10  ;;  %v2089_v51 = vmul.f32 %v3678_v12, %v3678_v12  ;;  %v2081_v52 = vmul.f32 %v3678_v12, %v4457_v53 }
 0x3fe   : > { %v4605_v13 = vadd.f32 %v3664_v42, %v2110_v45  ;;  %v2111_v14 = vmul.f32 %v2103_v5, %v2071_v11 }
 0x3ff   : > { %v3680_v43 = vpop.eup %3679  ;;  %v2104_v15 = vmul.f32 %v2096_v0, %v4454_v16  ;;  %v2097_v23 = vsub.f32 1.0, %v2089_v51  ;;  %v2077_v16 = vmul.f32 %v4587_v33, %v4445_v41  ;;  %v2126_v41 = vld [vmem:[%s5210_s11 + $0x18] sm:$0xff]  ;;  %v2134_v33 = vpop.permute.xlu0 %2133 }
 0x400   : > { %v3682_v56 = vpop.eup %3681  ;;  %v2082_v21 = vmul.f32 %v3680_v43, %v4459_v8  ;;  %v4609_v22 = vadd.f32 %v3666_v31, %v2111_v14  ;;  %v2090_v47 = vmul.f32 %v3680_v43, %v3680_v43 }
 0x401   : > { %v3684_v34 = vpop.eup %3683  ;;  %v2072_v30 = vsub.f32 1.0, %v3682_v56  ;;  %v2105_v50 = vmul.f32 %v2097_v23, %v4457_v53  ;;  %v2076_v53 = vmul.f32 %v4580_v24, %v4442_v35  ;;  %v2124_v35 = vld [vmem:[%s5210_s11 + $0x8] sm:$0xff]  ;;  %v2149_v24 = vpop.permute.xlu1 %2148 }
 0x402   : > { %2187 = vmatprep.subr.mxu1 %v2082_v21  ;;  %v2073_v27 = vsub.f32 1.0, %v3684_v34  ;;  %v2098_v20 = vsub.f32 1.0, %v2090_v47 }
 0x403   : > { %v3686_v25 = vpop.eup %3685  ;;  %2188 = vmatpush1.msra.mxu1 %v2081_v52  ;;  %v2112_v19 = vmul.f32 %v2104_v15, %v2072_v30 }
 0x404   : > { %2189 = vmatprep.subr.mxu1 %v2080_v37  ;;  %v2113_v32 = vmul.f32 %v2105_v50, %v2073_v27  ;;  %v2074_v44 = vsub.f32 1.0, %v3686_v25  ;;  %v2106_v46 = vmul.f32 %v2098_v20, %v4459_v8  ;;  %v2123_v8 = vld [vmem:[%s5210_s11] sm:$0xff] }
 0x405   : > { %2190 = vmatpush1.msra.mxu1 %v2079_v29  ;;  %v4619_v54 = vadd.f32 %v3674_v6, %v2112_v19  ;;  %v2139_v2 = vpop.permute.xlu1 %2138 }
 0x406   : > { %2191 = vmatprep.subr.mxu1 %v2078_v59  ;;  %v4623_v48 = vadd.f32 %v3678_v12, %v2113_v32  ;;  %v2114_v58 = vmul.f32 %v2106_v46, %v2074_v44 }
 0x407   : > { %2192 = vmatpush1.msra.mxu1 %v2077_v16 }
 0x408   : > { %2193 = vmatprep.subr.mxu1 %v2076_v53  ;;  %v4630_v42 = vadd.f32 %v3680_v43, %v2114_v58 }
 0x409   : > { %2194 = vmatpush1.msra.mxu1 %v2075_v49 }
 0x40a   : > { %3479 = vmatmul.mubr.msk.f32.vlgmr.msra.gmra.mxu1 %vm1563_vm2, %v2123_v8 }
 0x40b   : > { %2233 = vmatprep.mubr.f32.mxu1 %v3880_v17 }
 0x40e   : > { %3480 = vmatmul.mubr.msk.f32.gmra.mxu1 %vm1563_vm2, %v2124_v35 }
 0x40f   : > { %2239 = vmatprep.mubr.f32.mxu1 %v3880_v17 }
 0x412   : > { %3481 = vmatmul.mubr.msk.f32.gmra.mxu1 %vm1563_vm2, %v2125_v1 }
 0x413   : > { %2245 = vmatprep.mubr.f32.mxu1 %v3880_v17 }
 0x416   : > { %3482 = vmatmul.mubr.msk.f32.gmra.mxu1 %vm1563_vm2, %v2126_v41 }
 0x417   : > { %2919 = vmatprep.mubr.f32.mxu1 %v3880_v17 }
 0x4ca   : > { %v2229_v31 = vpop.f32.mrf.mxu1 }
 0x4cb   : > { %v4649_v40 = vadd.f32 %v2229_v31, %v2134_v33 }
 0x4cc   : > { %v2231_v39 = vpop.f32.mrf.mxu1 }
 0x4cd   : > { %v2276_v28 = vand.u32 2147483647, %v4649_v40  ;;  %v4652_v9 = vadd.f32 %v2231_v39, %v2134_v33  ;;  %v2252_v1 = vmax.f32 %v4649_v40, 0.0  ;;  %vm2260_vm7 = vcmp.ne.f32.partialorder %v4649_v40, %v4649_v40 }
 0x4ce   : > { %v2235_v7 = vpop.f32.mrf.mxu1 }
 0x4cf   : > { %v2284_v57 = vsub.f32 0.0, %v2276_v28  ;;  %v2277_v62 = vand.u32 2147483647, %v4652_v9  ;;  %v4655_v63 = vadd.f32 %v2235_v7, %v2139_v2  ;;  %vm2261_vm9 = vcmp.ne.f32.partialorder %v4652_v9, %v4652_v9 }
 0x4d0   : > { %v2237_v6 = vpop.f32.mrf.mxu1 }
 0x4d1   : > { %v2292_v3 = vmul.f32 1.442695, %v2284_v57  ;;  %v2285_v60 = vsub.f32 0.0, %v2277_v62  ;;  %v4657_v55 = vadd.f32 %v2237_v6, %v2139_v2  ;;  %v2278_v38 = vand.u32 2147483647, %v4655_v63 }
 0x4d2   : > { %v2241_v4 = vpop.f32.mrf.mxu1  ;;  %v2254_v31 = vmax.f32 %v4655_v63, 0.0  ;;  %vm2262_vm11 = vcmp.ne.f32.partialorder %v4655_v63, %v4655_v63 }
 0x4d3   : > { %3687 = vpow2.f32 %v2292_v3  ;;  %v2294_v5 = vmul.f32 1.442695, %v2285_v60  ;;  %v2286_v10 = vsub.f32 0.0, %v2278_v38  ;;  %v2279_v45 = vand.u32 2147483647, %v4657_v55 }
 0x4d4   : > { %v4661_v11 = vadd.f32 %v2241_v4, %v2144_v18  ;;  %v2243_v12 = vpop.f32.mrf.mxu1  ;;  %v2255_v2 = vmax.f32 %v4657_v55, 0.0  ;;  %vm2263_vm14 = vcmp.ne.f32.partialorder %v4657_v55, %v4657_v55 }
 0x4d5   : > { %3689 = vpow2.f32 %v2294_v5  ;;  %v4663_v0 = vadd.f32 %v2243_v12, %v2144_v18  ;;  %v2296_v14 = vmul.f32 1.442695, %v2286_v10  ;;  %v2287_v51 = vsub.f32 0.0, %v2279_v45 }
 0x4d6   : > { %v2247_v43 = vpop.f32.mrf.mxu1  ;;  %v2280_v15 = vand.u32 2147483647, %v4661_v11  ;;  %v2253_v18 = vmax.f32 %v4652_v9, 0.0  ;;  %v2256_v57 = vmax.f32 %v4661_v11, 0.0  ;;  %vm2264_vm3 = vcmp.ne.f32.partialorder %v4661_v11, %v4661_v11 }
 0x4d7   : > { %v2281_v56 = vand.u32 2147483647, %v4663_v0  ;;  %3691 = vpow2.f32 %v2296_v14  ;;  %v2298_v21 = vmul.f32 1.442695, %v2287_v51  ;;  %v4667_v23 = vadd.f32 %v2247_v43, %v2149_v24 }
 0x4d8   : > { %v2249_v47 = vpop.f32.mrf.mxu1  ;;  %v2288_v34 = vsub.f32 0.0, %v2280_v15  ;;  %v2257_v60 = vmax.f32 %v4663_v0, 0.0  ;;  %vm2265_vm4 = vcmp.ne.f32.partialorder %v4663_v0, %v4663_v0 }
 0x4d9   : > { %v2289_v52 = vsub.f32 0.0, %v2281_v56  ;;  %v4669_v30 = vadd.f32 %v2249_v47, %v2149_v24  ;;  %3693 = vpow2.f32 %v2298_v21  ;;  %v2282_v37 = vand.u32 2147483647, %v4667_v23 }
 0x4da   : > { %v2300_v27 = vmul.f32 1.442695, %v2288_v34  ;;  %v2258_v10 = vmax.f32 %v4667_v23, 0.0 }
 0x4db   : > { %v2302_v50 = vmul.f32 1.442695, %v2289_v52  ;;  %v2290_v20 = vsub.f32 0.0, %v2282_v37  ;;  %v2283_v25 = vand.u32 2147483647, %v4669_v30  ;;  %v2259_v45 = vmax.f32 %v4669_v30, 0.0 }
 0x4dc   : > { %3695 = vpow2.f32 %v2300_v27 }
 0x4dd   : > { %3697 = vpow2.f32 %v2302_v50  ;;  %v2304_v29 = vmul.f32 1.442695, %v2290_v20  ;;  %v2291_v19 = vsub.f32 0.0, %v2283_v25 }
 0x4df   : > { %3699 = vpow2.f32 %v2304_v29  ;;  %v2306_v32 = vmul.f32 1.442695, %v2291_v19 }
 0x4e0   : > { %v3688_v59 = vpop.eup %3687 }
 0x4e1   : > { %v2308_v44 = vadd.f32 1.0, %v3688_v59  ;;  %3701 = vpow2.f32 %v2306_v32  ;;  %v2311_v8 = vmul.f32 -0.5, %v3688_v59  ;;  %v2314_v41 = vand.u32 2147483647, %v3688_v59 }
 0x4e2   : > { %v3690_v46 = vpop.eup %3689 }
 0x4e3   : > { %3703 = vlog2.f32 %v2308_v44  ;;  %v2317_v16 = vadd.f32 1.0, %v3690_v46  ;;  %v2320_v33 = vmul.f32 -0.5, %v3690_v46  ;;  %v2312_v7 = vadd.f32 1.0, %v2311_v8 }
 0x4e4   : > { %v3692_v53 = vpop.eup %3691  ;;  %v2323_v6 = vand.u32 2147483647, %v3690_v46  ;;  %vm4689_vm8 = vcmp.lt.f32.partialorder %v2314_v41, 0.0004427343 }
 0x4e5   : > { %3705 = vlog2.f32 %v2317_v16  ;;  %v2326_v58 = vadd.f32 1.0, %v3692_v53  ;;  %v2329_v39 = vmul.f32 -0.5, %v3692_v53  ;;  %v2321_v12 = vadd.f32 1.0, %v2320_v33 }
 0x4e6   : > { %v3694_v49 = vpop.eup %3693  ;;  %v2332_v51 = vand.u32 2147483647, %v3692_v53  ;;  %v2313_v15 = vmul.f32 %v3688_v59, %v2312_v7  ;;  %vm4701_vm10 = vcmp.lt.f32.partialorder %v2323_v6, 0.0004427343 }
 0x4e7   : > { %3707 = vlog2.f32 %v2326_v58  ;;  %v2335_v35 = vadd.f32 1.0, %v3694_v49  ;;  %v2338_v3 = vmul.f32 -0.5, %v3694_v49  ;;  %v2330_v14 = vadd.f32 1.0, %v2329_v39 }
 0x4e8   : > { %v2341_v56 = vand.u32 2147483647, %v3694_v49  ;;  %v2322_v59 = vmul.f32 %v3690_v46, %v2321_v12  ;;  %vm4711_vm12 = vcmp.lt.f32.partialorder %v2332_v51, 0.0004427343 }
 0x4e9   : > { %v4675_v24 = vpop.eup %3695  ;;  %3709 = vlog2.f32 %v2335_v35  ;;  %v2339_v37 = vadd.f32 1.0, %v2338_v3  ;;  %v2331_v32 = vmul.f32 %v3692_v53, %v2330_v14 }
 0x4ea   : > { %v4678_v28 = vpop.eup %3697  ;;  %v2344_v62 = vadd.f32 1.0, %v4675_v24  ;;  %v2347_v21 = vmul.f32 -0.5, %v4675_v24  ;;  %v2350_v27 = vand.u32 2147483647, %v4675_v24  ;;  %vm4717_vm13 = vcmp.lt.f32.partialorder %v2341_v56, 0.0004427343 }
 0x4eb   : > { %v2353_v38 = vadd.f32 1.0, %v4678_v28  ;;  %v2356_v25 = vmul.f32 -0.5, %v4678_v28  ;;  %v2359_v29 = vand.u32 2147483647, %v4678_v28  ;;  %v2340_v46 = vmul.f32 %v3694_v49, %v2339_v37 }
 0x4ec   : > { %v4685_v4 = vpop.eup %3699  ;;  %3711 = vlog2.f32 %v2344_v62  ;;  %v2348_v35 = vadd.f32 1.0, %v2347_v21  ;;  %vm4723_vm15 = vcmp.lt.f32.partialorder %v2350_v27, 0.0004427343 }
 0x4ed   : > { %3713 = vlog2.f32 %v2353_v38  ;;  %v2362_v47 = vadd.f32 1.0, %v4685_v4  ;;  %v2365_v33 = vmul.f32 -0.5, %v4685_v4  ;;  %v2357_v62 = vadd.f32 1.0, %v2356_v25 }
 0x4ee   : > { %v4695_v43 = vpop.eup %3701  ;;  %vm4730_vm1 = vcmp.lt.f32.partialorder %v2359_v29, 0.0004427343  ;;  %v2349_v14 = vmul.f32 %v4675_v24, %v2348_v35 }
 0x4ef   : > { %v2371_v50 = vadd.f32 1.0, %v4695_v43  ;;  %3715 = vlog2.f32 %v2362_v47  ;;  %v2374_v5 = vmul.f32 -0.5, %v4695_v43  ;;  %v2377_v51 = vand.u32 2147483647, %v4695_v43 }
 0x4f0   : > { %v3704_v34 = vpop.eup %3703  ;;  %v2366_v47 = vadd.f32 1.0, %v2365_v33 }
 0x4f1   : > { %v2310_v20 = vmul.f32 0.6931472, %v3704_v34  ;;  %3717 = vlog2.f32 %v2371_v50  ;;  %v2358_v50 = vmul.f32 %v4678_v28, %v2357_v62  ;;  %v2375_v25 = vadd.f32 1.0, %v2374_v5 }
 0x4f2   : > { %v3706_v19 = vpop.eup %3705  ;;  %v2367_v8 = vmul.f32 %v4685_v4, %v2366_v47  ;;  %vm4774_vm6 = vcmp.lt.f32.partialorder %v2377_v51, 0.0004427343 }
 0x4f3   : > { %v2316_v16 = vsel %vm4689_vm8, %v2313_v15, %v2310_v20  ;;  %v2319_v58 = vmul.f32 0.6931472, %v3706_v19  ;;  %vm2267_vm8 = vcmp.ne.f32.partialorder %v4669_v30, %v4669_v30 }
 0x4f4   : > { %v2380_v41 = vadd.f32 %v2316_v16, %v2252_v1  ;;  %v3708_v39 = vpop.eup %3707  ;;  %v2368_v1 = vand.u32 2147483647, %v4685_v4 }
 0x4f5   : > { %v2325_v7 = vsel %vm4701_vm10, %v2322_v59, %v2319_v58  ;;  %v2328_v38 = vmul.f32 0.6931472, %v3708_v39 }
 0x4f6   : > { %v2388_v49 = vsel %vm2260_vm7, %v4649_v40, %v2380_v41  ;;  %v2381_v3 = vadd.f32 %v2325_v7, %v2253_v18  ;;  %v3710_v12 = vpop.eup %3709  ;;  %vm4757_vm5 = vcmp.lt.f32.partialorder %v2368_v1, 0.0004427343  ;;  %vm2266_vm7 = vcmp.ne.f32.partialorder %v4667_v23, %v4667_v23 }
 0x4f7   : > { %3719 = vtanh.f32 %v2388_v49  ;;  %v2404_v15 = vsub.f32 0.0, %v2388_v49  ;;  %v2334_v18 = vsel %vm4711_vm12, %v2331_v32, %v2328_v38  ;;  %v2337_v21 = vmul.f32 0.6931472, %v3710_v12 }
 0x4f8   : > { %v2389_v56 = vsel %vm2261_vm9, %v4652_v9, %v2381_v3  ;;  %v2382_v24 = vadd.f32 %v2334_v18, %v2254_v31  ;;  %v2376_v49 = vmul.f32 %v4695_v43, %v2375_v25 }
 0x4f9   : > { %3721 = vtanh.f32 %v2389_v56  ;;  %v2412_v34 = vmul.f32 1.442695, %v2404_v15  ;;  %v2405_v52 = vsub.f32 0.0, %v2389_v56  ;;  %v3712_v37 = vpop.eup %3711  ;;  %v2343_v27 = vsel %vm4717_vm13, %v2340_v46, %v2337_v21 }
 0x4fa   : > { %v3714_v29 = vpop.eup %3713  ;;  %v2390_v19 = vsel %vm2262_vm11, %v4655_v63, %v2382_v24  ;;  %v2383_v31 = vadd.f32 %v2343_v27, %v2255_v2  ;;  %v2346_v59 = vmul.f32 0.6931472, %v3712_v37 }
 0x4fb   : > { %3723 = vpow2.f32 %v2412_v34  ;;  %v2355_v32 = vmul.f32 0.6931472, %v3714_v29  ;;  %v2414_v44 = vmul.f32 1.442695, %v2405_v52  ;;  %v2406_v28 = vsub.f32 0.0, %v2390_v19 }
 0x4fc   : > { %3725 = vtanh.f32 %v2390_v19  ;;  %v2391_v16 = vsel %vm2263_vm14, %v4657_v55, %v2383_v31  ;;  %v2352_v58 = vsel %vm4723_vm15, %v2349_v14, %v2346_v59  ;;  %v3716_v2 = vpop.eup %3715 }
 0x4fd   : > { %3727 = vtanh.f32 %v2391_v16  ;;  %v2384_v41 = vadd.f32 %v2352_v58, %v2256_v57  ;;  %v2361_v46 = vsel %vm4730_vm1, %v2358_v50, %v2355_v32  ;;  %v2416_v33 = vmul.f32 1.442695, %v2406_v28 }
 0x4fe   : > { %v3718_v39 = vpop.eup %3717  ;;  %v2385_v53 = vadd.f32 %v2361_v46, %v2257_v60  ;;  %v2364_v7 = vmul.f32 0.6931472, %v3716_v2  ;;  %3729 = vpow2.f32 %v2414_v44  ;;  %v2407_v4 = vsub.f32 0.0, %v2391_v16 }
 0x4ff   : > { %v2392_v62 = vsel %vm2264_vm3, %v4661_v11, %v2384_v41  ;;  %v2373_v1 = vmul.f32 0.6931472, %v3718_v39  ;;  %3731 = vpow2.f32 %v2416_v33 }
 0x500   : > { %3733 = vtanh.f32 %v2392_v62  ;;  %v2393_v57 = vsel %vm2265_vm4, %v4663_v0, %v2385_v53  ;;  %v2370_v60 = vsel %vm4757_vm5, %v2367_v8, %v2364_v7  ;;  %v2418_v6 = vmul.f32 1.442695, %v2407_v4 }
 0x501   : > { %3735 = vtanh.f32 %v2393_v57  ;;  %v2386_v3 = vadd.f32 %v2370_v60, %v2258_v10  ;;  %v2379_v38 = vsel %vm4774_vm6, %v2376_v49, %v2373_v1  ;;  %v2408_v5 = vsub.f32 0.0, %v2392_v62 }
 0x502   : > { %v2387_v43 = vadd.f32 %v2379_v38, %v2259_v45  ;;  %3737 = vpow2.f32 %v2418_v6  ;;  %v2409_v12 = vsub.f32 0.0, %v2393_v57 }
 0x503   : > { %v2394_v51 = vsel %vm2266_vm7, %v4667_v23, %v2386_v3  ;;  %v2420_v10 = vmul.f32 1.442695, %v2408_v5 }
 0x504   : > { %v4803_v14 = vpop.eup %3719  ;;  %3739 = vtanh.f32 %v2394_v51  ;;  %v2395_v15 = vsel %vm2267_vm8, %v4669_v30, %v2387_v43  ;;  %v2422_v45 = vmul.f32 1.442695, %v2409_v12  ;;  %v2410_v21 = vsub.f32 0.0, %v2394_v51 }
 0x505   : > { %v2444_v56 = vmul.f32 %v4803_v14, %v4803_v14  ;;  %3741 = vtanh.f32 %v2395_v15  ;;  %v2411_v47 = vsub.f32 0.0, %v2395_v15 }
 0x506   : > { %v4811_v18 = vpop.eup %3721  ;;  %3743 = vpow2.f32 %v2420_v10  ;;  %v2424_v37 = vmul.f32 1.442695, %v2410_v21 }
 0x507   : > { %v2452_v24 = vsub.f32 1.0, %v2444_v56  ;;  %v2445_v34 = vmul.f32 %v4811_v18, %v4811_v18  ;;  %3745 = vpow2.f32 %v2422_v45  ;;  %v2426_v27 = vmul.f32 1.442695, %v2411_v47 }
 0x508   : > { %v3724_v52 = vpop.eup %3723  ;;  %3747 = vpow2.f32 %v2424_v37 }
 0x509   : > { %v3726_v50 = vpop.eup %3725  ;;  %v2428_v20 = vsub.f32 1.0, %v3724_v52  ;;  %v2460_v25 = vmul.f32 %v2452_v24, %v4649_v40  ;;  %v2453_v29 = vsub.f32 1.0, %v2445_v34  ;;  %3749 = vpow2.f32 %v2426_v27 }
 0x50a   : > { %v2446_v19 = vmul.f32 %v3726_v50, %v3726_v50  ;;  %v3728_v31 = vpop.eup %3727 }
 0x50b   : > { %v2468_v59 = vmul.f32 %v2460_v25, %v2428_v20  ;;  %v2461_v32 = vmul.f32 %v2453_v29, %v4652_v9  ;;  %v3730_v44 = vpop.eup %3729  ;;  %v2447_v16 = vmul.f32 %v3728_v31, %v3728_v31 }
 0x50c   : > { %v2454_v28 = vsub.f32 1.0, %v2446_v19  ;;  %v3732_v58 = vpop.eup %3731  ;;  %v2429_v35 = vsub.f32 1.0, %v3730_v44 }
 0x50d   : > { %v4818_v8 = vadd.f32 %v4803_v14, %v2468_v59  ;;  %v3734_v2 = vpop.eup %3733  ;;  %v2430_v41 = vsub.f32 1.0, %v3732_v58  ;;  %v2455_v33 = vsub.f32 1.0, %v2447_v16 }
 0x50e   : > { %v2462_v46 = vmul.f32 %v2454_v28, %v4655_v63  ;;  %v3736_v39 = vpop.eup %3735  ;;  %v2469_v53 = vmul.f32 %v2461_v32, %v2429_v35  ;;  %v2448_v7 = vmul.f32 %v3734_v2, %v3734_v2  ;;  %v2440_v19 = vmul.f32 %v3734_v2, %v4661_v11 }
 0x50f   : > { %v3738_v4 = vpop.eup %3737  ;;  %v2463_v1 = vmul.f32 %v2455_v33, %v4657_v55  ;;  %v2449_v49 = vmul.f32 %v3736_v39, %v3736_v39  ;;  %v2441_v27 = vmul.f32 %v3736_v39, %v4663_v0  ;;  %v2439_v28 = vmul.f32 %v3728_v31, %v4657_v55 }
 0x510   : > { %v2470_v62 = vmul.f32 %v2462_v46, %v2430_v41  ;;  %v4823_v57 = vadd.f32 %v4811_v18, %v2469_v53  ;;  %v2431_v60 = vsub.f32 1.0, %v3738_v4  ;;  %v2456_v6 = vsub.f32 1.0, %v2448_v7 }
 0x511   : > { %v3740_v3 = vpop.eup %3739  ;;  %v2457_v5 = vsub.f32 1.0, %v2449_v49  ;;  %v2436_v55 = vmul.f32 %v4803_v14, %v4649_v40  ;;  %v2486_v40 = vld [vmem:[%s5212_s13 + $0x10] sm:$0xff]  ;;  %v2487_v14 = vld [vmem:[%s5212_s13 + $0x18] sm:$0xff] }
 0x512   : > { %v4825_v38 = vadd.f32 %v3726_v50, %v2470_v62  ;;  %v3742_v43 = vpop.eup %3741  ;;  %v2471_v12 = vmul.f32 %v2463_v1, %v2431_v60  ;;  %v2464_v51 = vmul.f32 %v2456_v6, %v4661_v11  ;;  %v2450_v10 = vmul.f32 %v3740_v3, %v3740_v3 }
 0x513   : > { %v3744_v15 = vpop.eup %3743  ;;  %v2443_v56 = vmul.f32 %v3742_v43, %v4669_v30  ;;  %v2465_v45 = vmul.f32 %v2457_v5, %v4663_v0  ;;  %v2451_v21 = vmul.f32 %v3742_v43, %v3742_v43  ;;  %v2442_v24 = vmul.f32 %v3740_v3, %v4667_v23 }
 0x514   : > { %v3746_v47 = vpop.eup %3745  ;;  %v4831_v34 = vadd.f32 %v3728_v31, %v2471_v12  ;;  %v2432_v52 = vsub.f32 1.0, %v3744_v15  ;;  %v2458_v37 = vsub.f32 1.0, %v2450_v10  ;;  %v2438_v0 = vmul.f32 %v3726_v50, %v4655_v63 }
 0x515   : > { %2548 = vmatprep.subr.mxu0 %v2443_v56  ;;  %v2433_v20 = vsub.f32 1.0, %v3746_v47  ;;  %v2459_v25 = vsub.f32 1.0, %v2451_v21  ;;  %v3748_v29 = vpop.eup %3747  ;;  %v2437_v11 = vmul.f32 %v4811_v18, %v4652_v9  ;;  %v2485_v9 = vld [vmem:[%s5212_s13 + $0x8] sm:$0xff]  ;;  %v2505_v18 = vpop.permute.xlu0 %2504 }
 0x516   : > { %2549 = vmatpush1.msra.mxu0 %v2442_v24  ;;  %v2472_v59 = vmul.f32 %v2464_v51, %v2432_v52  ;;  %v2466_v32 = vmul.f32 %v2458_v37, %v4667_v23  ;;  %v3750_v44 = vpop.eup %3749  ;;  %v2434_v58 = vsub.f32 1.0, %v3748_v29 }
 0x517   : > { %2550 = vmatprep.subr.mxu0 %v2441_v27  ;;  %v2473_v16 = vmul.f32 %v2465_v45, %v2433_v20  ;;  %v2467_v35 = vmul.f32 %v2459_v25, %v4669_v30  ;;  %v2435_v46 = vsub.f32 1.0, %v3750_v44  ;;  %v2484_v30 = vld [vmem:[%s5212_s13] sm:$0xff] }
 0x518   : > { %2551 = vmatpush1.msra.mxu0 %v2440_v19  ;;  %v4839_v41 = vadd.f32 %v3734_v2, %v2472_v59  ;;  %v2474_v23 = vmul.f32 %v2466_v32, %v2434_v58  ;;  %v2510_v2 = vpop.permute.xlu1 %2509 }
 0x519   : > { %2552 = vmatprep.subr.mxu0 %v2439_v28  ;;  %v4843_v33 = vadd.f32 %v3736_v39, %v2473_v16  ;;  %v2475_v31 = vmul.f32 %v2467_v35, %v2435_v46  ;;  %v2495_v39 = vpop.permute.xlu0 %2494 }
 0x51a   : > { %2553 = vmatpush1.msra.mxu0 %v2438_v0  ;;  %v4850_v63 = vadd.f32 %v3740_v3, %v2474_v23 }
 0x51b   : > { %2554 = vmatprep.subr.mxu0 %v2437_v11  ;;  %v4852_v50 = vadd.f32 %v3742_v43, %v2475_v31 }
 0x51c   : > { %2555 = vmatpush1.msra.mxu0 %v2436_v55  ;;  %v2500_v60 = vpop.permute.xlu1 %2499 }
 0x51d   : > { %3483 = vmatmul.mubr.msk.f32.vlgmr.msra.gmra.mxu0 %vm1563_vm2, %v2484_v30 }
 0x51e   : > { %2594 = vmatprep.mubr.f32.mxu0 %v3880_v17 }
 0x521   : > { %3484 = vmatmul.mubr.msk.f32.gmra.mxu0 %vm1563_vm2, %v2485_v9 }
 0x522   : > { %2600 = vmatprep.mubr.f32.mxu0 %v3880_v17 }
 0x525   : > { %3485 = vmatmul.mubr.msk.f32.gmra.mxu0 %vm1563_vm2, %v2486_v40 }
 0x526   : > { %2606 = vmatprep.mubr.f32.mxu0 %v3880_v17 }
 0x529   : > { %3486 = vmatmul.mubr.msk.f32.gmra.mxu0 %vm1563_vm2, %v2487_v14 }
 0x52a   : > { %3123 = vmatprep.mubr.f32.mxu0 %v3880_v17 }
 0x5dd   : > { %v2590_v53 = vpop.f32.mrf.mxu0 }
 0x5de   : > { %v4871_v7 = vadd.f32 %v2590_v53, %v2495_v39 }
 0x5df   : > { %v2592_v4 = vpop.f32.mrf.mxu0 }
 0x5e0   : > { %v2637_v62 = vand.u32 2147483647, %v4871_v7  ;;  %v4874_v1 = vadd.f32 %v2592_v4, %v2495_v39  ;;  %vm2621_vm9 = vcmp.ne.f32.partialorder %v4871_v7, %v4871_v7 }
 0x5e1   : > { %v2596_v49 = vpop.f32.mrf.mxu0 }
 0x5e2   : > { %v2645_v6 = vsub.f32 0.0, %v2637_v62  ;;  %v2638_v3 = vand.u32 2147483647, %v4874_v1  ;;  %v4877_v5 = vadd.f32 %v2596_v49, %v2500_v60  ;;  %v2613_v49 = vmax.f32 %v4871_v7, 0.0 }
 0x5e3   : > { %v2598_v43 = vpop.f32.mrf.mxu0  ;;  %vm2622_vm11 = vcmp.ne.f32.partialorder %v4874_v1, %v4874_v1 }
 0x5e4   : > { %v2653_v12 = vmul.f32 1.442695, %v2645_v6  ;;  %v2646_v51 = vsub.f32 0.0, %v2638_v3  ;;  %v4879_v10 = vadd.f32 %v2598_v43, %v2500_v60  ;;  %v2639_v15 = vand.u32 2147483647, %v4877_v5 }
 0x5e5   : > { %v2602_v56 = vpop.f32.mrf.mxu0  ;;  %v2614_v6 = vmax.f32 %v4874_v1, 0.0  ;;  %vm2623_vm13 = vcmp.ne.f32.partialorder %v4877_v5, %v4877_v5 }
 0x5e6   : > { %3751 = vpow2.f32 %v2653_v12  ;;  %v2655_v45 = vmul.f32 1.442695, %v2646_v51  ;;  %v2647_v21 = vsub.f32 0.0, %v2639_v15  ;;  %v2640_v47 = vand.u32 2147483647, %v4879_v10 }
 0x5e7   : > { %v4883_v24 = vadd.f32 %v2602_v56, %v2505_v18  ;;  %v2604_v52 = vpop.f32.mrf.mxu0  ;;  %v2615_v12 = vmax.f32 %v4877_v5, 0.0  ;;  %vm2624_vm1 = vcmp.ne.f32.partialorder %v4879_v10, %v4879_v10 }
 0x5e8   : > { %3753 = vpow2.f32 %v2655_v45  ;;  %v4885_v37 = vadd.f32 %v2604_v52, %v2505_v18  ;;  %v2657_v27 = vmul.f32 1.442695, %v2647_v21  ;;  %v2648_v20 = vsub.f32 0.0, %v2640_v47 }
 0x5e9   : > { %v2608_v25 = vpop.f32.mrf.mxu0  ;;  %v2641_v29 = vand.u32 2147483647, %v4883_v24  ;;  %v2616_v45 = vmax.f32 %v4879_v10, 0.0  ;;  %v2617_v21 = vmax.f32 %v4883_v24, 0.0  ;;  %vm2625_vm5 = vcmp.ne.f32.partialorder %v4883_v24, %v4883_v24 }
 0x5ea   : > { %v2642_v19 = vand.u32 2147483647, %v4885_v37  ;;  %3755 = vpow2.f32 %v2657_v27  ;;  %v2659_v59 = vmul.f32 1.442695, %v2648_v20  ;;  %v4889_v32 = vadd.f32 %v2608_v25, %v2510_v2 }
 0x5eb   : > { %v2610_v44 = vpop.f32.mrf.mxu0  ;;  %v2649_v28 = vsub.f32 0.0, %v2641_v29  ;;  %v2618_v20 = vmax.f32 %v4885_v37, 0.0  ;;  %vm2626_vm6 = vcmp.ne.f32.partialorder %v4885_v37, %v4885_v37 }
 0x5ec   : > { %v2650_v16 = vsub.f32 0.0, %v2642_v19  ;;  %v4891_v58 = vadd.f32 %v2610_v44, %v2510_v2  ;;  %3757 = vpow2.f32 %v2659_v59  ;;  %v2643_v35 = vand.u32 2147483647, %v4889_v32 }
 0x5ed   : > { %v2661_v0 = vmul.f32 1.442695, %v2649_v28  ;;  %v2619_v59 = vmax.f32 %v4889_v32, 0.0 }
 0x5ee   : > { %v2663_v46 = vmul.f32 1.442695, %v2650_v16  ;;  %v2651_v11 = vsub.f32 0.0, %v2643_v35  ;;  %v2644_v23 = vand.u32 2147483647, %v4891_v58  ;;  %v2620_v44 = vmax.f32 %v4891_v58, 0.0 }
 0x5ef   : > { %3759 = vpow2.f32 %v2661_v0 }
 0x5f0   : > { %3761 = vpow2.f32 %v2663_v46  ;;  %v2665_v55 = vmul.f32 1.442695, %v2651_v11  ;;  %v2652_v30 = vsub.f32 0.0, %v2644_v23 }
 0x5f2   : > { %3763 = vpow2.f32 %v2665_v55  ;;  %v2667_v9 = vmul.f32 1.442695, %v2652_v30 }
 0x5f3   : > { %v3752_v31 = vpop.eup %3751 }
 0x5f4   : > { %v2669_v40 = vadd.f32 1.0, %v3752_v31  ;;  %3765 = vpow2.f32 %v2667_v9  ;;  %v2672_v4 = vmul.f32 -0.5, %v3752_v31  ;;  %v2675_v60 = vand.u32 2147483647, %v3752_v31 }
 0x5f5   : > { %v3754_v14 = vpop.eup %3753 }
 0x5f6   : > { %3767 = vlog2.f32 %v2669_v40  ;;  %v2678_v18 = vadd.f32 1.0, %v3754_v14  ;;  %v2681_v43 = vmul.f32 -0.5, %v3754_v14  ;;  %v2673_v56 = vadd.f32 1.0, %v2672_v4 }
 0x5f7   : > { %v3756_v2 = vpop.eup %3755  ;;  %v2684_v52 = vand.u32 2147483647, %v3754_v14  ;;  %vm4911_vm10 = vcmp.lt.f32.partialorder %v2675_v60, 0.0004427343 }
 0x5f8   : > { %3769 = vlog2.f32 %v2678_v18  ;;  %v2687_v39 = vadd.f32 1.0, %v3756_v2  ;;  %v2690_v51 = vmul.f32 -0.5, %v3756_v2  ;;  %v2682_v28 = vadd.f32 1.0, %v2681_v43 }
 0x5f9   : > { %v3758_v53 = vpop.eup %3757  ;;  %v2693_v35 = vand.u32 2147483647, %v3756_v2  ;;  %v2674_v46 = vmul.f32 %v3752_v31, %v2673_v56  ;;  %vm4923_vm12 = vcmp.lt.f32.partialorder %v2684_v52, 0.0004427343 }
 0x5fa   : > { %3771 = vlog2.f32 %v2687_v39  ;;  %v2696_v62 = vadd.f32 1.0, %v3758_v53  ;;  %v2699_v27 = vmul.f32 -0.5, %v3758_v53  ;;  %v2691_v16 = vadd.f32 1.0, %v2690_v51 }
 0x5fb   : > { %v2702_v11 = vand.u32 2147483647, %v3758_v53  ;;  %v2683_v43 = vmul.f32 %v3754_v14, %v2682_v28  ;;  %vm4933_vm14 = vcmp.lt.f32.partialorder %v2693_v35, 0.0004427343 }
 0x5fc   : > { %v4897_v3 = vpop.eup %3759  ;;  %3773 = vlog2.f32 %v2696_v62  ;;  %v2700_v40 = vadd.f32 1.0, %v2699_v27  ;;  %v2692_v51 = vmul.f32 %v3756_v2, %v2691_v16 }
 0x5fd   : > { %v4900_v15 = vpop.eup %3761  ;;  %v2705_v47 = vadd.f32 1.0, %v4897_v3  ;;  %v2708_v23 = vmul.f32 -0.5, %v4897_v3  ;;  %v2711_v18 = vand.u32 2147483647, %v4897_v3  ;;  %vm4939_vm15 = vcmp.lt.f32.partialorder %v2702_v11, 0.0004427343 }
 0x5fe   : > { %v2714_v25 = vadd.f32 1.0, %v4900_v15  ;;  %v2717_v31 = vmul.f32 -0.5, %v4900_v15  ;;  %v2720_v62 = vand.u32 2147483647, %v4900_v15  ;;  %v2701_v14 = vmul.f32 %v3758_v53, %v2700_v40 }
 0x5ff   : > { %v4907_v29 = vpop.eup %3763  ;;  %3775 = vlog2.f32 %v2705_v47  ;;  %vm4945_vm3 = vcmp.lt.f32.partialorder %v2711_v18, 0.0004427343 }
 0x600   : > { %3777 = vlog2.f32 %v2714_v25  ;;  %v2723_v55 = vadd.f32 1.0, %v4907_v29  ;;  %v2709_v25 = vadd.f32 1.0, %v2708_v23  ;;  %v2726_v28 = vmul.f32 -0.5, %v4907_v29 }
 0x601   : > { %v4917_v0 = vpop.eup %3765  ;;  %v2718_v35 = vadd.f32 1.0, %v2717_v31  ;;  %vm4952_vm4 = vcmp.lt.f32.partialorder %v2720_v62, 0.0004427343 }
 0x602   : > { %v2732_v39 = vadd.f32 1.0, %v4917_v0  ;;  %3779 = vlog2.f32 %v2723_v55  ;;  %v2710_v9 = vmul.f32 %v4897_v3, %v2709_v25  ;;  %v2738_v18 = vand.u32 2147483647, %v4917_v0 }
 0x603   : > { %v3768_v30 = vpop.eup %3767  ;;  %v2727_v62 = vadd.f32 1.0, %v2726_v28  ;;  %v2719_v25 = vmul.f32 %v4900_v15, %v2718_v35 }
 0x604   : > { %v2671_v4 = vmul.f32 0.6931472, %v3768_v30  ;;  %3781 = vlog2.f32 %v2732_v39  ;;  %v2735_v30 = vmul.f32 -0.5, %v4917_v0  ;;  %vm4996_vm8 = vcmp.lt.f32.partialorder %v2738_v18, 0.0004427343 }
 0x605   : > { %v3770_v60 = vpop.eup %3769 }
 0x606   : > { %v2677_v47 = vsel %vm4911_vm10, %v2674_v46, %v2671_v4  ;;  %v2680_v52 = vmul.f32 0.6931472, %v3770_v60  ;;  %vm2628_vm10 = vcmp.ne.f32.partialorder %v4891_v58, %v4891_v58 }
 0x607   : > { %v2741_v55 = vadd.f32 %v2677_v47, %v2613_v49  ;;  %v3772_v16 = vpop.eup %3771  ;;  %v2729_v49 = vand.u32 2147483647, %v4907_v29 }
 0x608   : > { %v2686_v19 = vsel %vm4923_vm12, %v2683_v43, %v2680_v52  ;;  %v2689_v23 = vmul.f32 0.6931472, %v3772_v16 }
 0x609   : > { %v2749_v53 = vsel %vm2621_vm9, %v4871_v7, %v2741_v55  ;;  %v2742_v11 = vadd.f32 %v2686_v19, %v2614_v6  ;;  %v3774_v40 = vpop.eup %3773  ;;  %vm4979_vm7 = vcmp.lt.f32.partialorder %v2729_v49, 0.0004427343  ;;  %v2728_v49 = vmul.f32 %v4907_v29, %v2727_v62 }
 0x60a   : > { %3783 = vtanh.f32 %v2749_v53  ;;  %v2765_v39 = vsub.f32 0.0, %v2749_v53  ;;  %v2695_v6 = vsel %vm4933_vm14, %v2692_v51, %v2689_v23  ;;  %v2698_v31 = vmul.f32 0.6931472, %v3774_v40 }
 0x60b   : > { %v2750_v4 = vsel %vm2622_vm11, %v4874_v1, %v2742_v11  ;;  %v2743_v3 = vadd.f32 %v2695_v6, %v2615_v12  ;;  %v2736_v51 = vadd.f32 1.0, %v2735_v30  ;;  %vm2627_vm9 = vcmp.ne.f32.partialorder %v4889_v32, %v4889_v32 }
 0x60c   : > { %3785 = vtanh.f32 %v2750_v4  ;;  %v2773_v60 = vmul.f32 1.442695, %v2765_v39  ;;  %v2766_v43 = vsub.f32 0.0, %v2750_v4  ;;  %v3776_v47 = vpop.eup %3775  ;;  %v2704_v52 = vsel %vm4939_vm15, %v2701_v14, %v2698_v31 }
 0x60d   : > { %v3778_v55 = vpop.eup %3777  ;;  %v2751_v28 = vsel %vm2623_vm13, %v4877_v5, %v2743_v3  ;;  %v2744_v12 = vadd.f32 %v2704_v52, %v2616_v45  ;;  %v2707_v16 = vmul.f32 0.6931472, %v3776_v47  ;;  %v2737_v4 = vmul.f32 %v4917_v0, %v2736_v51 }
 0x60e   : > { %3787 = vpow2.f32 %v2773_v60  ;;  %v2716_v27 = vmul.f32 0.6931472, %v3778_v55  ;;  %v2775_v14 = vmul.f32 1.442695, %v2766_v43  ;;  %v2767_v15 = vsub.f32 0.0, %v2751_v28 }
 0x60f   : > { %3789 = vtanh.f32 %v2751_v28  ;;  %v2752_v19 = vsel %vm2624_vm1, %v4879_v10, %v2744_v12  ;;  %v2713_v35 = vsel %vm4945_vm3, %v2710_v9, %v2707_v16  ;;  %v3780_v45 = vpop.eup %3779 }
 0x610   : > { %3791 = vtanh.f32 %v2752_v19  ;;  %v2745_v11 = vadd.f32 %v2713_v35, %v2617_v21  ;;  %v2722_v23 = vsel %vm4952_vm4, %v2719_v25, %v2716_v27  ;;  %v2777_v30 = vmul.f32 1.442695, %v2767_v15 }
 0x611   : > { %v3782_v40 = vpop.eup %3781  ;;  %v2746_v2 = vadd.f32 %v2722_v23, %v2618_v20  ;;  %v2725_v9 = vmul.f32 0.6931472, %v3780_v45  ;;  %3793 = vpow2.f32 %v2775_v14  ;;  %v2768_v29 = vsub.f32 0.0, %v2752_v19 }
 0x612   : > { %v2753_v18 = vsel %vm2625_vm5, %v4883_v24, %v2745_v11  ;;  %v2734_v39 = vmul.f32 0.6931472, %v3782_v40  ;;  %3795 = vpow2.f32 %v2777_v30 }
 0x613   : > { %3797 = vtanh.f32 %v2753_v18  ;;  %v2754_v21 = vsel %vm2626_vm6, %v4885_v37, %v2746_v2  ;;  %v2731_v20 = vsel %vm4979_vm7, %v2728_v49, %v2725_v9  ;;  %v2779_v46 = vmul.f32 1.442695, %v2768_v29 }
 0x614   : > { %3799 = vtanh.f32 %v2754_v21  ;;  %v2747_v6 = vadd.f32 %v2731_v20, %v2619_v59  ;;  %v2740_v31 = vsel %vm4996_vm8, %v2737_v4, %v2734_v39  ;;  %v2769_v62 = vsub.f32 0.0, %v2753_v18 }
 0x615   : > { %v2748_v0 = vadd.f32 %v2740_v31, %v2620_v44  ;;  %3801 = vpow2.f32 %v2779_v46  ;;  %v2770_v3 = vsub.f32 0.0, %v2754_v21 }
 0x616   : > { %v2755_v43 = vsel %vm2627_vm9, %v4889_v32, %v2747_v6  ;;  %v2781_v59 = vmul.f32 1.442695, %v2769_v62 }
 0x617   : > { %v5025_v60 = vpop.eup %3783  ;;  %3803 = vtanh.f32 %v2755_v43  ;;  %v2756_v47 = vsel %vm2628_vm10, %v4891_v58, %v2748_v0  ;;  %v2783_v44 = vmul.f32 1.442695, %v2770_v3  ;;  %v2771_v56 = vsub.f32 0.0, %v2755_v43 }
 0x618   : > { %v2805_v52 = vmul.f32 %v5025_v60, %v5025_v60  ;;  %3805 = vtanh.f32 %v2756_v47  ;;  %v2772_v51 = vsub.f32 0.0, %v2756_v47 }
 0x619   : > { %v5033_v25 = vpop.eup %3785  ;;  %3807 = vpow2.f32 %v2781_v59  ;;  %v2785_v16 = vmul.f32 1.442695, %v2771_v56 }
 0x61a   : > { %v2813_v55 = vsub.f32 1.0, %v2805_v52  ;;  %v2806_v28 = vmul.f32 %v5033_v25, %v5033_v25  ;;  %3809 = vpow2.f32 %v2783_v44  ;;  %v2787_v27 = vmul.f32 1.442695, %v2772_v51 }
 0x61b   : > { %v3788_v12 = vpop.eup %3787  ;;  %3811 = vpow2.f32 %v2785_v16 }
 0x61c   : > { %v3790_v14 = vpop.eup %3789  ;;  %v2789_v15 = vsub.f32 1.0, %v3788_v12  ;;  %v2821_v19 = vmul.f32 %v2813_v55, %v4871_v7  ;;  %v2814_v35 = vsub.f32 1.0, %v2806_v28  ;;  %3813 = vpow2.f32 %v2787_v27 }
 0x61d   : > { %v2807_v49 = vmul.f32 %v3790_v14, %v3790_v14  ;;  %v3792_v53 = vpop.eup %3791 }
 0x61e   : > { %v2829_v45 = vmul.f32 %v2821_v19, %v2789_v15  ;;  %v2822_v11 = vmul.f32 %v2814_v35, %v4874_v1  ;;  %v3794_v23 = vpop.eup %3793  ;;  %v2808_v40 = vmul.f32 %v3792_v53, %v3792_v53 }
 0x61f   : > { %v2815_v30 = vsub.f32 1.0, %v2807_v49  ;;  %v3796_v2 = vpop.eup %3795  ;;  %v2790_v29 = vsub.f32 1.0, %v3794_v23 }
 0x620   : > { %v5040_v9 = vadd.f32 %v5025_v60, %v2829_v45  ;;  %v3798_v18 = vpop.eup %3797  ;;  %v2791_v39 = vsub.f32 1.0, %v3796_v2  ;;  %v2816_v21 = vsub.f32 1.0, %v2808_v40 }
 0x621   : > { %v2823_v4 = vmul.f32 %v2815_v30, %v4877_v5  ;;  %v3800_v20 = vpop.eup %3799  ;;  %v2830_v46 = vmul.f32 %v2822_v11, %v2790_v29  ;;  %v2809_v6 = vmul.f32 %v3798_v18, %v3798_v18 }
 0x622   : > { %v3802_v31 = vpop.eup %3801  ;;  %v2824_v0 = vmul.f32 %v2816_v21, %v4879_v10  ;;  %v2810_v3 = vmul.f32 %v3800_v20, %v3800_v20  ;;  %v2802_v30 = vmul.f32 %v3800_v20, %v4885_v37 }
 0x623   : > { %v2831_v62 = vmul.f32 %v2823_v4, %v2791_v39  ;;  %v5045_v43 = vadd.f32 %v5033_v25, %v2830_v46  ;;  %v2792_v59 = vsub.f32 1.0, %v3802_v31  ;;  %v2817_v47 = vsub.f32 1.0, %v2809_v6 }
 0x624   : > { %v3804_v52 = vpop.eup %3803  ;;  %v2818_v56 = vsub.f32 1.0, %v2810_v3  ;;  %v2801_v39 = vmul.f32 %v3798_v18, %v4883_v24  ;;  %v2800_v6 = vmul.f32 %v3792_v53, %v4879_v10  ;;  %v2797_v10 = vmul.f32 %v5025_v60, %v4871_v7  ;;  %v3815_v7 = vld [vmem:[%s4399_s23] sm:$0xff] }
 0x625   : > { %v5047_v44 = vadd.f32 %v3790_v14, %v2831_v62  ;;  %v3806_v51 = vpop.eup %3805  ;;  %v2832_v55 = vmul.f32 %v2824_v0, %v2792_v59  ;;  %v2825_v28 = vmul.f32 %v2817_v47, %v4883_v24  ;;  %v2811_v12 = vmul.f32 %v3804_v52, %v3804_v52 }
 0x626   : > { %v3808_v16 = vpop.eup %3807  ;;  %v2804_v27 = vmul.f32 %v3806_v51, %v4891_v58  ;;  %v2826_v15 = vmul.f32 %v2818_v56, %v4885_v37  ;;  %v2812_v19 = vmul.f32 %v3806_v51, %v3806_v51  ;;  %v2803_v49 = vmul.f32 %v3804_v52, %v4889_v32 }
 0x627   : > { %v3810_v35 = vpop.eup %3809  ;;  %v5053_v45 = vadd.f32 %v3792_v53, %v2832_v55  ;;  %v2793_v11 = vsub.f32 1.0, %v3808_v16  ;;  %v2819_v23 = vsub.f32 1.0, %v2811_v12  ;;  %v2799_v37 = vmul.f32 %v3790_v14, %v4877_v5  ;;  %v3816_v55 = vld [vmem:[%s4399_s23 + $0x8] sm:$0xff]  ;;  %s698_s23 = scalar_lea.vmem [#allocation3], %s3443_s24  ;;  %s3821_s24 = sshll.u32 %s3887_s3, 4  ;;  %s3822_s24 = int_to_ptr.vmem [resolvable:$false] %s3821_s24 }
 0x628   : > { %2879 = vmatprep.subr.mxu1 %v2804_v27  ;;  %v2794_v40 = vsub.f32 1.0, %v3810_v35  ;;  %v2820_v2 = vsub.f32 1.0, %v2812_v19  ;;  %v3812_v29 = vpop.eup %3811  ;;  %v2798_v24 = vmul.f32 %v5033_v25, %v4874_v1  ;;  %v2850_v1 = vpop.permute.xlu1 %2849  ;;  %v2932_v27 = vld [vmem:[%s5219_s20 + $0x10] sm:$0xff]  ;;  %s3363_s28 = sshll.u32 %s698_s23, 4  ;;  %s3823_s6 = scalar_lea.vmem %s3822_s24, 512  ;;  %s3364_s28 = int_to_ptr.vmem [resolvable:$true] %s3363_s28 }
 0x629   : > { %2880 = vmatpush1.msra.mxu1 %v2803_v49  ;;  %v2833_v4 = vmul.f32 %v2825_v28, %v2793_v11  ;;  %v2827_v21 = vmul.f32 %v2819_v23, %v4889_v32  ;;  %v3814_v46 = vpop.eup %3813  ;;  %v2795_v62 = vsub.f32 1.0, %v3812_v29  ;;  %v2845_v32 = vld [vmem:[%s5214_s15] sm:$0xff]  ;;  %s3817_s0 = scalar_lea.vmem %s3364_s28, 256  ;;  %p3824_p3 = scmp.lt.s32.totalorder %s3364_s28, %s3822_s24 }
 0x62a   : > { %2881 = vmatprep.subr.mxu1 %v2802_v30  ;;  %v2834_v31 = vmul.f32 %v2826_v15, %v2794_v40  ;;  %v2828_v0 = vmul.f32 %v2820_v2, %v4891_v58  ;;  %v2796_v59 = vsub.f32 1.0, %v3814_v46  ;;  %v2933_v15 = vld [vmem:[%s5219_s20 + $0x18] sm:$0xff]  ;;  %p3818_p0 = scmp.ne.s32.totalorder %s3364_s28, %s3817_s0  ;;  %p3825_p4 = scmp.lt.s32.totalorder %s3823_s6, %s3817_s0 }
 0x62b   : > { %2882 = vmatpush1.msra.mxu1 %v2801_v39  ;;  %v2841_v3 = vadd.f32 %v3798_v18, %v2833_v4  ;;  %v2835_v56 = vmul.f32 %v2827_v21, %v2795_v62 }
 0x62c   : > { %2883 = vmatprep.subr.mxu1 %v2800_v6  ;;  %v2842_v47 = vadd.f32 %v3800_v20, %v2834_v31  ;;  %v2836_v58 = vmul.f32 %v2828_v0, %v2796_v59  ;;  %v3043_v0 = vld [vmem:[%s5218_s19] sm:$0xff]  ;;  %p3819_p1 = pnand %p3818_p0, %p4037_p6  ;;  %p3826_p5 = por %p3825_p4, %p3824_p3 }
 0x62d   : > { %2884 = vmatpush1.msra.mxu1 %v2799_v37  ;;  %v2843_v5 = vadd.f32 %v3804_v52, %v2835_v56  ;;  %v2930_v52 = vld [vmem:[%s5219_s20] sm:$0xff] }
 0x62e   : > { %2885 = vmatprep.subr.mxu1 %v2798_v24  ;;  %v2844_v14 = vadd.f32 %v3806_v51, %v2836_v58  ;;  %v2931_v51 = vld [vmem:[%s5219_s20 + $0x8] sm:$0xff]  ;;  %p3820_p2 = pneg %p3819_p1 }
 0x62f   : > { %2886 = vmatpush1.msra.mxu1 %v2797_v10 }
 0x630   : > { %3487 = vmatmul.mubr.msk.f32.vlgmr.msra.gmra.mxu1 %vm1563_vm2, %v2845_v32  ;;  %p3827_p7 = pnand %p3826_p5, %p3820_p2 }
 0x631   : > { %3010 = vmatprep.mubr.f32.mxu1 %v3880_v17 }
 0x6f0   : > { %v2921_v25 = vpop.f32.mrf.mxu1 }
 0x6f1   : > { %v2922_v53 = vadd.f32 %v2921_v25, %v2850_v1 }
 0x6f2   : > { %v2923_v18 = vpop.f32.mrf.mxu1 }
 0x6f3   : > { %v2924_v20 = vadd.f32 %v2923_v18, %v2850_v1  ;;  %v2926_v60 = vsub.f32 %v2922_v53, %v3815_v7 }
 0x6f5   : > { %v2927_v28 = vsub.f32 %v2924_v20, %v3816_v55  ;;  %v5074_v16 = vmul.f32 2.0, %v2926_v60 }
 0x6f7   : > { %v5072_v12 = vmul.f32 2.0, %v2927_v28 }
 0x6f9   : > { %2976 = vmatprep.subr.mxu1 %v5072_v12 }
 0x6fa   : > { %2977 = vmatpush1.msra.mxu1 %v5074_v16 }
 0x6fb   : > { %3488 = vmatmul.mubr.msk.f32.vlgmr.msra.gmra.mxu1 %vm1154_vm0, %v2930_v52 }
 0x6fc   : > { %3016 = vmatprep.mubr.f32.mxu1 %v3880_v17 }
 0x6ff   : > { %3489 = vmatmul.mubr.msk.f32.gmra.mxu1 %vm1154_vm0, %v2931_v51 }
 0x700   : > { %3022 = vmatprep.mubr.f32.mxu1 %v3880_v17 }
 0x703   : > { %3490 = vmatmul.mubr.msk.f32.gmra.mxu1 %vm1154_vm0, %v2932_v27 }
 0x704   : > { %3028 = vmatprep.mubr.f32.mxu1 %v3880_v17 }
 0x707   : > { %3491 = vmatmul.mubr.msk.f32.gmra.mxu1 %vm1154_vm0, %v2933_v15 }
 0x708   : > { %3236 = vmatprep.mubr.f32.mxu1 %v3880_v17 }
 0x7bb   : > { %v3012_v19 = vpop.f32.mrf.mxu1 }
 0x7bc   : > { %v3035_v62 = vmul.f32 %v3012_v19, %v5040_v9  ;;  %v3045_v9 = vld [vmem:[%s5218_s19 + $0x10] sm:$0xff] }
 0x7bd   : > { %v3014_v35 = vpop.f32.mrf.mxu1 }
 0x7be   : > { %v3036_v31 = vmul.f32 %v3014_v35, %v5045_v43  ;;  %v3046_v43 = vld [vmem:[%s5218_s19 + $0x18] sm:$0xff] }
 0x7bf   : > { %v3018_v49 = vpop.f32.mrf.mxu1 }
 0x7c0   : > { %v3037_v6 = vmul.f32 %v3018_v49, %v5047_v44  ;;  %v3044_v44 = vld [vmem:[%s5218_s19 + $0x8] sm:$0xff] }
 0x7c1   : > { %v3020_v11 = vpop.f32.mrf.mxu1 }
 0x7c2   : > { %v3038_v46 = vmul.f32 %v3020_v11, %v5053_v45 }
 0x7c3   : > { %v3024_v23 = vpop.f32.mrf.mxu1 }
 0x7c4   : > { %v3039_v21 = vmul.f32 %v3024_v23, %v2841_v3 }
 0x7c5   : > { %v3026_v30 = vpop.f32.mrf.mxu1 }
 0x7c6   : > { %v3040_v4 = vmul.f32 %v3026_v30, %v2842_v47 }
 0x7c7   : > { %v3030_v40 = vpop.f32.mrf.mxu1 }
 0x7c8   : > { %v3041_v39 = vmul.f32 %v3030_v40, %v2843_v5 }
 0x7c9   : > { %v3032_v2 = vpop.f32.mrf.mxu1 }
 0x7ca   : > { %v3042_v29 = vmul.f32 %v3032_v2, %v2844_v14 }
 0x7cc   : > { %3083 = vmatprep.subr.mxu0 %v3042_v29 }
 0x7cd   : > { %3084 = vmatpush1.msra.mxu0 %v3041_v39 }
 0x7ce   : > { %3085 = vmatprep.subr.mxu0 %v3040_v4 }
 0x7cf   : > { %3086 = vmatpush1.msra.mxu0 %v3039_v21 }
 0x7d0   : > { %3087 = vmatprep.subr.mxu0 %v3038_v46 }
 0x7d1   : > { %3088 = vmatpush1.msra.mxu0 %v3037_v6 }
 0x7d2   : > { %3089 = vmatprep.subr.mxu0 %v3036_v31 }
 0x7d3   : > { %3090 = vmatpush1.msra.mxu0 %v3035_v62 }
 0x7d4   : > { %3492 = vmatmul.mubr.msk.f32.vlgmr.msra.gmra.mxu0 %vm1563_vm2, %v3043_v0 }
 0x7d5   : > { %3129 = vmatprep.mubr.f32.mxu0 %v3880_v17 }
 0x7d8   : > { %3493 = vmatmul.mubr.msk.f32.gmra.mxu0 %vm1563_vm2, %v3044_v44 }
 0x7d9   : > { %3135 = vmatprep.mubr.f32.mxu0 %v3880_v17 }
 0x7dc   : > { %3494 = vmatmul.mubr.msk.f32.gmra.mxu0 %vm1563_vm2, %v3045_v9 }
 0x7dd   : > { %3141 = vmatprep.mubr.f32.mxu0 %v3880_v17 }
 0x7e0   : > { %3495 = vmatmul.mubr.msk.f32.gmra.mxu0 %vm1563_vm2, %v3046_v43 }
 0x7e1   : > { %3337 = vmatprep.mubr.f32.mxu0 %v3880_v17 }
 0x894   : > { %v3125_v45 = vpop.f32.mrf.mxu0 }
 0x895   : > { %v3148_v18 = vmul.f32 %v3125_v45, %v4818_v8  ;;  %v3158_v8 = vld [vmem:[%s5217_s18 + $0x10] sm:$0xff] }
 0x896   : > { %v3127_v37 = vpop.f32.mrf.mxu0 }
 0x897   : > { %v3149_v53 = vmul.f32 %v3127_v37, %v4823_v57  ;;  %v3159_v57 = vld [vmem:[%s5217_s18 + $0x18] sm:$0xff] }
 0x898   : > { %v3131_v3 = vpop.f32.mrf.mxu0 }
 0x899   : > { %v3150_v25 = vmul.f32 %v3131_v3, %v4825_v38  ;;  %v3157_v38 = vld [vmem:[%s5217_s18 + $0x8] sm:$0xff] }
 0x89a   : > { %v3133_v59 = vpop.f32.mrf.mxu0 }
 0x89b   : > { %v3151_v1 = vmul.f32 %v3133_v59, %v4831_v34 }
 0x89c   : > { %v3137_v24 = vpop.f32.mrf.mxu0 }
 0x89d   : > { %v3152_v14 = vmul.f32 %v3137_v24, %v4839_v41 }
 0x89e   : > { %v3139_v47 = vpop.f32.mrf.mxu0 }
 0x89f   : > { %v3153_v5 = vmul.f32 %v3139_v47, %v4843_v33  ;;  %v3156_v33 = vld [vmem:[%s5217_s18] sm:$0xff] }
 0x8a0   : > { %v3143_v56 = vpop.f32.mrf.mxu0 }
 0x8a1   : > { %v3154_v58 = vmul.f32 %v3143_v56, %v4850_v63 }
 0x8a2   : > { %v3145_v10 = vpop.f32.mrf.mxu0 }
 0x8a3   : > { %v3155_v32 = vmul.f32 %v3145_v10, %v4852_v50 }
 0x8a5   : > { %3196 = vmatprep.subr.mxu1 %v3155_v32 }
 0x8a6   : > { %3197 = vmatpush1.msra.mxu1 %v3154_v58 }
 0x8a7   : > { %3198 = vmatprep.subr.mxu1 %v3153_v5 }
 0x8a8   : > { %3199 = vmatpush1.msra.mxu1 %v3152_v14 }
 0x8a9   : > { %3200 = vmatprep.subr.mxu1 %v3151_v1 }
 0x8aa   : > { %3201 = vmatpush1.msra.mxu1 %v3150_v25 }
 0x8ab   : > { %3202 = vmatprep.subr.mxu1 %v3149_v53 }
 0x8ac   : > { %3203 = vmatpush1.msra.mxu1 %v3148_v18 }
 0x8ad   : > { %3496 = vmatmul.mubr.msk.f32.vlgmr.msra.gmra.mxu1 %vm1563_vm2, %v3156_v33 }
 0x8ae   : > { %3242 = vmatprep.mubr.f32.mxu1 %v3880_v17 }
 0x8b1   : > { %3497 = vmatmul.mubr.msk.f32.gmra.mxu1 %vm1563_vm2, %v3157_v38 }
 0x8b2   : > { %3248 = vmatprep.mubr.f32.mxu1 %v3880_v17 }
 0x8b5   : > { %3498 = vmatmul.mubr.msk.f32.gmra.mxu1 %vm1563_vm2, %v3158_v8 }
 0x8b6   : > { %3254 = vmatprep.mubr.f32.mxu1 %v3880_v17 }
 0x8b9   : > { %3499 = vmatmul.mubr.msk.f32.gmra.mxu1 %vm1563_vm2, %v3159_v57 }
 0x96d   : > { %v3238_v34 = vpop.f32.mrf.mxu1 }
 0x96f   : > { %v3240_v41 = vpop.f32.mrf.mxu1 }
 0x970   : > { %v3262_v19 = vmul.f32 %v3240_v41, %v4600_v36 }
 0x971   : > { %v3244_v63 = vpop.f32.mrf.mxu1 }
 0x972   : > { %v3263_v15 = vmul.f32 %v3244_v63, %v4603_v61 }
 0x973   : > { %v3246_v50 = vpop.f32.mrf.mxu1 }
 0x974   : > { %v3264_v27 = vmul.f32 %v3246_v50, %v4605_v13 }
 0x975   : > { %v3250_v20 = vpop.f32.mrf.mxu1 }
 0x976   : > { %v3265_v51 = vmul.f32 %v3250_v20, %v4609_v22 }
 0x977   : > { %v3252_v7 = vpop.f32.mrf.mxu1 }
 0x978   : > { %v3266_v17 = vmul.f32 %v3252_v7, %v4619_v54  ;;  %v3269_v54 = vld [vmem:[%s5216_s17] sm:$0xff] }
 0x979   : > { %v3256_v60 = vpop.f32.mrf.mxu1 }
 0x97a   : > { %v3267_v52 = vmul.f32 %v3256_v60, %v4623_v48 }
 0x97b   : > { %v3258_v55 = vpop.f32.mrf.mxu1 }
 0x97c   : > { %v3268_v28 = vmul.f32 %v3258_v55, %v4630_v42  ;;  %v3261_v42 = vmul.f32 %v3238_v34, %v4594_v26 }
 0x97e   : > { %3297 = vmatprep.subr.mxu0 %v3268_v28 }
 0x97f   : > { %3298 = vmatpush1.msra.mxu0 %v3267_v52 }
 0x980   : > { %3299 = vmatprep.subr.mxu0 %v3266_v17 }
 0x981   : > { %3300 = vmatpush1.msra.mxu0 %v3265_v51 }
 0x982   : > { %3301 = vmatprep.subr.mxu0 %v3264_v27 }
 0x983   : > { %3302 = vmatpush1.msra.mxu0 %v3263_v15 }
 0x984   : > { %3303 = vmatprep.subr.mxu0 %v3262_v19 }
 0x985   : > { %3304 = vmatpush1.msra.mxu0 %v3261_v42 }
 0x986   : > { %3500 = vmatmul.mubr.msk.f32.vlgmr.msra.gmra.mxu0 %vm1563_vm2, %v3269_v54 }
 0xa46   : > { %v3339_v13 = vpop.f32.mrf.mxu0 }
 0xa47   : > { %v3344_v36 = vsub.f32 %v3339_v13, %v5074_v16 }
 0xa48   : > { %v3341_v61 = vpop.f32.mrf.mxu0 }
 0xa49   : > { %3346 = vst [vmem:[%s698_s23] sm:$0xff] %v3344_v36  ;;  %v3345_v26 = vsub.f32 %v3341_v61, %v5072_v12 }
 0xa4b   : > { %3347 = vst [vmem:[%s698_s23 + $0x8] sm:$0xff] %v3345_v26 }
 0xa4c   : > { %3830 = shalt.err (!%p3827_p7)
}
 0xa4d   : > { %s3831_s7 = scalar_lea.hbm %s3361_s27, 256  ;;  %s3835_s23 = scalar_lea.hbm %s5220_s21, 512 }
 0xa4e   : > { %p3832_p10 = scmp.ne.s32.totalorder %s3361_s27, %s3831_s7  ;;  %p3836_p13 = scmp.lt.s32.totalorder %s3361_s27, %s5220_s21 }
 0xa4f   : > { %p3837_p0 = scmp.lt.s32.totalorder %s3835_s23, %s3831_s7 }
 0xa50   : > { %p3833_p11 = pnand %p3832_p10, %p4037_p6 }
 0xa51   : > { %p3838_p1 = por %p3837_p0, %p3836_p13 }
 0xa52   : > { %p3834_p12 = pneg %p3833_p11 }
 0xa54   : > { %p3839_p9 = pnand %p3838_p1, %p3834_p12 }
 0xa56   : > { %3842 = shalt.err (!%p3839_p9)
}
 0xa57   : > { %3518 = dma.vmem_to_hbm [thread:$0]  (%p4037_p6), %s3364_s28, 256, %s3361_s27, %s3349_s29  }
 0xa58 PF: > { %s5311_s6 = sld [smem:[#allocation6_spill]] }
 0xa59   : > { %s5313_s3 = sld [smem:[#allocation8_spill]] }
 0xa5e   : > { %s3375_s24 = sand.u32 1, %s5311_s6  }
 0xa5f   : > { %p5314_p2 = scmp.ge.s32.totalorder %s5313_s3, 2  ;;  %s3376_s26 = scalar_lea.sflag [#allocation4], %s3375_s24 }
 0xa61   : > { %p3521_p3 = pnand %p5314_p2, %p4041_p8 }
 0xa63   : > { %p3522_p4 = pneg %p3521_p3 }
 0xa65   : > { %3860 = dma.done.wait (%p3522_p4), %s3376_s26, 256  }
 0xa66   : > { %3862 = vsyncadd (%p3522_p4), %s3376_s26, 4294967040  ;;  %s5315_s27 = sld [smem:[#allocation9_spill]]  ;;  %s5318_s2 = smov %s3869_s25 }
 0xa67   : > { %s5316_s7 = sld [smem:[#allocation7_spill]] }
 0xa68   : > { %s5317_s26 = sld [smem:[#allocation10_spill]] }
 0xa6c   : > { %p31_p9 = scmp.ge.s32.totalorder %s5315_s27, 4  }
 0xa6d   : > { %s5319_s25 = smov %s5316_s7 }
 0xa6e   :  { %33 = sbr.rel (!%p31_p9) target bundleno = 12 (0xc), region = 170 }
 0xa73   :  { %3381 = vsyncpa [#allocation4], 1 }
 0xa74   :  { %3383 = vsyncpa [#allocation4 + $0x1], 1 }

</bundles_post_ra>
